<compile_context>
chip_gen: v7x
topology: tpu7x:2x2x1
jax: 0.10.0
libtpu: 0.0.40
codegen_flags: <defaults>
</compile_context>

<pallas_src>
import functools
import math

import jax
import jax.numpy as jnp
from jax.experimental import pallas as pl
from jax.experimental.pallas import tpu as pltpu


# ----------------------------- fused attention kernel -----------------------

def _self_attention_kernel(nb, seq, dim, heads, head_dim, mxu_dtype,
                           x_ref, wq_ref, bq_ref, wk_ref, bk_ref, wv_ref, bv_ref,
                           o_ref):
    """One grid step == `nb` batch elements (grid axis marked "parallel")."""
    f32 = jnp.float32
    rows = nb * seq
    scale = f32(1.0 / math.sqrt(head_dim))

    # ---- fused Q/K/V projections on the batch-folded row block -------------
    # (nb, L, D) -> (nb*L, D): leading-dim collapse only (lane dim untouched),
    # so each projection is ONE well-shaped (nb*L, D) x (D, D) MXU matmul.
    x = x_ref[...].reshape(rows, dim)
    xm = x.astype(mxu_dtype)                 # MXU operands in bf16 ...

    def project(w_ref, b_ref):
        # ... accumulate in f32 (preferred_element_type) + f32 bias add.
        return jnp.dot(xm, w_ref[...].astype(mxu_dtype),
                       preferred_element_type=f32) + b_ref[...]

    q = project(wq_ref, bq_ref) * scale      # fold 1/sqrt(head_dim) into Q once
    k = project(wk_ref, bk_ref)
    v = project(wv_ref, bv_ref)

    # ---- heads -> leading batch dim ------------------------------------------
    # Regroup once (static, unrolled) so the attention matmuls are batched
    # dot_generals and the softmax is a single vectorized pass.
    def split_heads(t):                      # (nb*L, D) -> (nb*heads, L, hd)
        parts = [t[b * seq:(b + 1) * seq, h * head_dim:(h + 1) * head_dim]
                 for b in range(nb) for h in range(heads)]
        return jnp.stack(parts, axis=0)

    qh = split_heads(q).astype(mxu_dtype)
    kh = split_heads(k).astype(mxu_dtype)
    vh = split_heads(v).astype(mxu_dtype)

    # ---- scaled-dot-product attention, softmax fully in f32 ------------------
    s = jnp.einsum('bqd,bkd->bqk', qh, kh,
                   preferred_element_type=f32)          # (nb*heads, L, L)
    s_max = jnp.max(s, axis=-1, keepdims=True)
    e = jnp.exp(s - s_max)
    denom = jnp.sum(e, axis=-1, keepdims=True)
    p = e * pl.reciprocal(denom, approx=True)           # divide on the EUP slot
    o = jnp.einsum('bqk,bkd->bqd', p.astype(mxu_dtype), vh,
                   preferred_element_type=f32)          # (nb*heads, L, hd)

    # ---- repack heads along lanes; ONE lane-dense (nb, L, D) store -----------
    out = jnp.stack(
        [jnp.concatenate([o[b * heads + h] for h in range(heads)], axis=-1)
         for b in range(nb)],
        axis=0)
    o_ref[...] = out.astype(o_ref.dtype)


# ----------------------------- wrapper ---------------------------------------

def _build_call(N, L, D, heads, grid_blocks, mxu_dtype, single_buffer_weights):
    head_dim = D // heads
    nb = N // grid_blocks
    kernel = functools.partial(_self_attention_kernel,
                               nb, L, D, heads, head_dim, mxu_dtype)

    # Weights/biases are grid-invariant (constant index_map): keep them VMEM
    # resident; single-buffer them when supported (halves their VMEM footprint,
    # which matters on v7x's 64 MiB VMEM once D scales up).
    resident = {"pipeline_mode": pl.Buffered(1)} if single_buffer_weights else {}
    x_spec = pl.BlockSpec((nb, L, D), lambda g: (g, 0, 0))
    w_spec = pl.BlockSpec((D, D), lambda g: (0, 0), **resident)
    b_spec = pl.BlockSpec((1, D), lambda g: (0, 0), **resident)

    return pl.pallas_call(
        kernel,
        out_shape=jax.ShapeDtypeStruct((N, L, D), jnp.float32),
        grid=(grid_blocks,),
        in_specs=[x_spec, w_spec, b_spec, w_spec, b_spec, w_spec, b_spec],
        out_specs=x_spec,
        compiler_params=pltpu.CompilerParams(
            dimension_semantics=("parallel",)),
    )


def self_attention(x, wq, bq, wk, bk, wv, bv, *, heads,
                   grid_blocks=None, mxu_dtype=jnp.bfloat16):
    """Fused multi-head self-attention: softmax(QK^T/sqrt(hd)) V (no out-proj)."""
    N, L, D = x.shape
    assert (D // heads) * heads == D, "feature_dim must be divisible by heads"
    if grid_blocks is None:
        # >=2 "parallel" steps so v7x's two TensorCores split the batch; use
        # grid_blocks=1 on v5e/v6e (single core) to skip per-step overhead.
        grid_blocks = 2 if (N % 2 == 0 and N >= 2) else 1
    assert N % grid_blocks == 0, "batch must divide evenly into grid blocks"

    args = (x, wq, bq, wk, bk, wv, bv)
    try:
        return _build_call(N, L, D, heads, grid_blocks, mxu_dtype, True)(*args)
    except Exception:
        # TODO(synk): this jax/Mosaic version rejects pl.Buffered(1) single
        # buffering; fall back to default double-buffered resident weights.
        return _build_call(N, L, D, heads, grid_blocks, mxu_dtype, False)(*args)


# ----------------------------- plain-JAX reference (for verification) --------

def self_attention_ref(x, wq, bq, wk, bk, wv, bv, heads):
    N, L, D = x.shape
    hd = D // heads
    q = (x @ wq + bq).reshape(N, L, heads, hd).transpose(0, 2, 1, 3)
    k = (x @ wk + bk).reshape(N, L, heads, hd).transpose(0, 2, 1, 3)
    v = (x @ wv + bv).reshape(N, L, heads, hd).transpose(0, 2, 1, 3)
    s = jnp.einsum('nhqd,nhkd->nhqk', q, k) / jnp.sqrt(jnp.float32(hd))
    a = jax.nn.softmax(s, axis=-1)
    o = jnp.einsum('nhqk,nhkd->nhqd', a, v)
    return o.transpose(0, 2, 1, 3).reshape(N, L, D)


# ----------------------------- main -------------------------------------------

if __name__ == "__main__":
    N, L, D, HEADS = 2, 16, 128, 4          # batch, seq, feature_dim, heads

    root = jax.random.PRNGKey(0)
    kx, kq, kk, kv = jax.random.split(root, 4)

    def lin(key, scale=0.08):
        kw, kb = jax.random.split(key)
        return (scale * jax.random.normal(kw, (D, D), jnp.float32),
                scale * jax.random.normal(kb, (1, D), jnp.float32))

    wq, bq = lin(kq)
    wk, bk = lin(kk)
    wv, bv = lin(kv)
    x = jax.random.normal(kx, (N, L, D), jnp.float32)

    ref = self_attention_ref(x, wq, bq, wk, bk, wv, bv, HEADS)

    # (1) Default config: bf16 MXU operands, 2 "parallel" batch blocks (v7x).
    out = self_attention(x, wq, bq, wk, bk, wv, bv, heads=HEADS)
    jax.block_until_ready(out)
    assert out.shape == (N, L, D)
    err_bf16 = float(jnp.max(jnp.abs(out - ref)))
    assert err_bf16 < 5e-2, f"bf16-MXU path max abs err vs reference: {err_bf16}"

    # (2) Exact-f32 config with the whole batch folded into a single grid step
    #     (the v5e/v6e-preferred shape).  Tolerance is tight; the only remaining
    #     approximation is the EUP approximate reciprocal in the softmax.
    out_f32 = self_attention(x, wq, bq, wk, bk, wv, bv, heads=HEADS,
                             grid_blocks=1, mxu_dtype=jnp.float32)
    jax.block_until_ready(out_f32)
    err_f32 = float(jnp.max(jnp.abs(out_f32 - ref)))
    assert err_f32 < 1e-2, f"f32 path max abs err vs reference: {err_f32}"

    print("KERNEL_OK")
</pallas_src>

<mosaic_0001>
module attributes {stable_mosaic.version = 11 : i64} {
  func.func @_self_attention_kernel(%arg0: i32, %arg1: memref<1x16x128xf32, #tpu.memory_space<vmem>>, %arg2: memref<128x128xf32, #tpu.memory_space<vmem>>, %arg3: memref<1x128xf32, #tpu.memory_space<vmem>>, %arg4: memref<128x128xf32, #tpu.memory_space<vmem>>, %arg5: memref<1x128xf32, #tpu.memory_space<vmem>>, %arg6: memref<128x128xf32, #tpu.memory_space<vmem>>, %arg7: memref<1x128xf32, #tpu.memory_space<vmem>>, %arg8: memref<1x16x128xf32, #tpu.memory_space<vmem>>) attributes {dimension_semantics = [#tpu.dimension_semantics<parallel>], iteration_bounds = array<i64: 2>, scalar_prefetch = 0 : i64, scratch_operands = 0 : i64, tpu.core_type = #tpu.core_type<tc>, window_params = [{transform_indices = @transform_0, window_bounds = array<i64: 1, 16, 128>}, {pipeline_mode = #tpu.pipeline_mode<synchronous>, transform_indices = @transform_1, window_bounds = array<i64: 128, 128>}, {pipeline_mode = #tpu.pipeline_mode<synchronous>, transform_indices = @transform_2, window_bounds = array<i64: 1, 128>}, {pipeline_mode = #tpu.pipeline_mode<synchronous>, transform_indices = @transform_3, window_bounds = array<i64: 128, 128>}, {pipeline_mode = #tpu.pipeline_mode<synchronous>, transform_indices = @transform_4, window_bounds = array<i64: 1, 128>}, {pipeline_mode = #tpu.pipeline_mode<synchronous>, transform_indices = @transform_5, window_bounds = array<i64: 128, 128>}, {pipeline_mode = #tpu.pipeline_mode<synchronous>, transform_indices = @transform_6, window_bounds = array<i64: 1, 128>}, {transform_indices = @transform_7, window_bounds = array<i64: 1, 16, 128>}]} {
    %c0 = arith.constant 0 : index
    %c0_0 = arith.constant 0 : index
    %c0_1 = arith.constant 0 : index
    %0 = vector.load %arg1[%c0, %c0_0, %c0_1] : memref<1x16x128xf32, #tpu.memory_space<vmem>>, vector<1x16x128xf32>
    %1 = vector.shape_cast %0 : vector<1x16x128xf32> to vector<16x128xf32>
    %2 = arith.truncf %1 : vector<16x128xf32> to vector<16x128xbf16>
    %c0_2 = arith.constant 0 : index
    %c0_3 = arith.constant 0 : index
    %3 = vector.load %arg2[%c0_2, %c0_3] : memref<128x128xf32, #tpu.memory_space<vmem>>, vector<128x128xf32>
    %4 = arith.truncf %3 : vector<128x128xf32> to vector<128x128xbf16>
    %cst = arith.constant dense<0.000000e+00> : vector<16x128xf32>
    %5 = tpu.matmul %2, %4, %cst {dimension_numbers = #tpu.dot_dimension_numbers<[1], [0], [0], [1], [0, 0, 1, 1], [], []>} : vector<16x128xbf16>, vector<128x128xbf16>, vector<16x128xf32> -> vector<16x128xf32>
    %c0_4 = arith.constant 0 : index
    %c0_5 = arith.constant 0 : index
    %6 = vector.load %arg3[%c0_4, %c0_5] : memref<1x128xf32, #tpu.memory_space<vmem>>, vector<1x128xf32>
    %7 = vector.broadcast %6 : vector<1x128xf32> to vector<16x128xf32>
    %8 = arith.addf %5, %7 : vector<16x128xf32>
    %cst_6 = arith.constant 0.176776692 : f32
    %9 = vector.broadcast %cst_6 : f32 to vector<16x128xf32>
    %10 = arith.mulf %8, %9 : vector<16x128xf32>
    %c0_7 = arith.constant 0 : index
    %c0_8 = arith.constant 0 : index
    %11 = vector.load %arg4[%c0_7, %c0_8] : memref<128x128xf32, #tpu.memory_space<vmem>>, vector<128x128xf32>
    %12 = arith.truncf %11 : vector<128x128xf32> to vector<128x128xbf16>
    %cst_9 = arith.constant dense<0.000000e+00> : vector<16x128xf32>
    %13 = tpu.matmul %2, %12, %cst_9 {dimension_numbers = #tpu.dot_dimension_numbers<[1], [0], [0], [1], [0, 0, 1, 1], [], []>} : vector<16x128xbf16>, vector<128x128xbf16>, vector<16x128xf32> -> vector<16x128xf32>
    %c0_10 = arith.constant 0 : index
    %c0_11 = arith.constant 0 : index
    %14 = vector.load %arg5[%c0_10, %c0_11] : memref<1x128xf32, #tpu.memory_space<vmem>>, vector<1x128xf32>
    %15 = vector.broadcast %14 : vector<1x128xf32> to vector<16x128xf32>
    %16 = arith.addf %13, %15 : vector<16x128xf32>
    %c0_12 = arith.constant 0 : index
    %c0_13 = arith.constant 0 : index
    %17 = vector.load %arg6[%c0_12, %c0_13] : memref<128x128xf32, #tpu.memory_space<vmem>>, vector<128x128xf32>
    %18 = arith.truncf %17 : vector<128x128xf32> to vector<128x128xbf16>
    %cst_14 = arith.constant dense<0.000000e+00> : vector<16x128xf32>
    %19 = tpu.matmul %2, %18, %cst_14 {dimension_numbers = #tpu.dot_dimension_numbers<[1], [0], [0], [1], [0, 0, 1, 1], [], []>} : vector<16x128xbf16>, vector<128x128xbf16>, vector<16x128xf32> -> vector<16x128xf32>
    %c0_15 = arith.constant 0 : index
    %c0_16 = arith.constant 0 : index
    %20 = vector.load %arg7[%c0_15, %c0_16] : memref<1x128xf32, #tpu.memory_space<vmem>>, vector<1x128xf32>
    %21 = vector.broadcast %20 : vector<1x128xf32> to vector<16x128xf32>
    %22 = arith.addf %19, %21 : vector<16x128xf32>
    %23 = vector.extract_strided_slice %10 {offsets = [0, 0], sizes = [16, 32], strides = [1, 1]} : vector<16x128xf32> to vector<16x32xf32>
    %24 = vector.extract_strided_slice %10 {offsets = [0, 32], sizes = [16, 32], strides = [1, 1]} : vector<16x128xf32> to vector<16x32xf32>
    %25 = vector.extract_strided_slice %10 {offsets = [0, 64], sizes = [16, 32], strides = [1, 1]} : vector<16x128xf32> to vector<16x32xf32>
    %26 = vector.extract_strided_slice %10 {offsets = [0, 96], sizes = [16, 32], strides = [1, 1]} : vector<16x128xf32> to vector<16x32xf32>
    %27 = vector.shape_cast %23 : vector<16x32xf32> to vector<1x16x32xf32>
    %28 = vector.shape_cast %24 : vector<16x32xf32> to vector<1x16x32xf32>
    %29 = vector.shape_cast %25 : vector<16x32xf32> to vector<1x16x32xf32>
    %30 = vector.shape_cast %26 : vector<16x32xf32> to vector<1x16x32xf32>
    %31 = tpu.concatenate %27, %28, %29, %30 in 0 : vector<1x16x32xf32>, vector<1x16x32xf32>, vector<1x16x32xf32>, vector<1x16x32xf32> -> vector<4x16x32xf32>
    %32 = arith.truncf %31 : vector<4x16x32xf32> to vector<4x16x32xbf16>
    %33 = vector.extract_strided_slice %16 {offsets = [0, 0], sizes = [16, 32], strides = [1, 1]} : vector<16x128xf32> to vector<16x32xf32>
    %34 = vector.extract_strided_slice %16 {offsets = [0, 32], sizes = [16, 32], strides = [1, 1]} : vector<16x128xf32> to vector<16x32xf32>
    %35 = vector.extract_strided_slice %16 {offsets = [0, 64], sizes = [16, 32], strides = [1, 1]} : vector<16x128xf32> to vector<16x32xf32>
    %36 = vector.extract_strided_slice %16 {offsets = [0, 96], sizes = [16, 32], strides = [1, 1]} : vector<16x128xf32> to vector<16x32xf32>
    %37 = vector.shape_cast %33 : vector<16x32xf32> to vector<1x16x32xf32>
    %38 = vector.shape_cast %34 : vector<16x32xf32> to vector<1x16x32xf32>
    %39 = vector.shape_cast %35 : vector<16x32xf32> to vector<1x16x32xf32>
    %40 = vector.shape_cast %36 : vector<16x32xf32> to vector<1x16x32xf32>
    %41 = tpu.concatenate %37, %38, %39, %40 in 0 : vector<1x16x32xf32>, vector<1x16x32xf32>, vector<1x16x32xf32>, vector<1x16x32xf32> -> vector<4x16x32xf32>
    %42 = arith.truncf %41 : vector<4x16x32xf32> to vector<4x16x32xbf16>
    %43 = vector.extract_strided_slice %22 {offsets = [0, 0], sizes = [16, 32], strides = [1, 1]} : vector<16x128xf32> to vector<16x32xf32>
    %44 = vector.extract_strided_slice %22 {offsets = [0, 32], sizes = [16, 32], strides = [1, 1]} : vector<16x128xf32> to vector<16x32xf32>
    %45 = vector.extract_strided_slice %22 {offsets = [0, 64], sizes = [16, 32], strides = [1, 1]} : vector<16x128xf32> to vector<16x32xf32>
    %46 = vector.extract_strided_slice %22 {offsets = [0, 96], sizes = [16, 32], strides = [1, 1]} : vector<16x128xf32> to vector<16x32xf32>
    %47 = vector.shape_cast %43 : vector<16x32xf32> to vector<1x16x32xf32>
    %48 = vector.shape_cast %44 : vector<16x32xf32> to vector<1x16x32xf32>
    %49 = vector.shape_cast %45 : vector<16x32xf32> to vector<1x16x32xf32>
    %50 = vector.shape_cast %46 : vector<16x32xf32> to vector<1x16x32xf32>
    %51 = tpu.concatenate %47, %48, %49, %50 in 0 : vector<1x16x32xf32>, vector<1x16x32xf32>, vector<1x16x32xf32>, vector<1x16x32xf32> -> vector<4x16x32xf32>
    %52 = arith.truncf %51 : vector<4x16x32xf32> to vector<4x16x32xbf16>
    "tpu.trace_start"() <{level = 10 : i32, message = "bqd,bkd->bqk"}> : () -> ()
    %cst_17 = arith.constant dense<0.000000e+00> : vector<4x16x16xf32>
    %53 = tpu.matmul %32, %42, %cst_17 {dimension_numbers = #tpu.dot_dimension_numbers<[2], [2], [1], [1], [0, 0, 0, 1, 1, 1], [0], [0]>} : vector<4x16x32xbf16>, vector<4x16x32xbf16>, vector<4x16x16xf32> -> vector<4x16x16xf32>
    "tpu.trace_stop"() : () -> ()
    %cst_18 = arith.constant dense<0xFF800000> : vector<4x16xf32>
    %54 = vector.multi_reduction <maximumf>, %53, %cst_18 [2] : vector<4x16x16xf32> to vector<4x16xf32>
    %55 = vector.shape_cast %54 : vector<4x16xf32> to vector<4x16x1xf32>
    %56 = vector.broadcast %55 : vector<4x16x1xf32> to vector<4x16x16xf32>
    %57 = arith.subf %53, %56 : vector<4x16x16xf32>
    %58 = math.exp %57 : vector<4x16x16xf32>
    %cst_19 = arith.constant dense<0.000000e+00> : vector<4x16xf32>
    %59 = vector.multi_reduction <add>, %58, %cst_19 [2] : vector<4x16x16xf32> to vector<4x16xf32>
    %60 = vector.shape_cast %59 : vector<4x16xf32> to vector<4x16x1xf32>
    %61 = tpu.reciprocal %60 {approx = true} : vector<4x16x1xf32> -> vector<4x16x1xf32>
    %62 = vector.broadcast %61 : vector<4x16x1xf32> to vector<4x16x16xf32>
    %63 = arith.mulf %58, %62 : vector<4x16x16xf32>
    %64 = arith.truncf %63 : vector<4x16x16xf32> to vector<4x16x16xbf16>
    "tpu.trace_start"() <{level = 10 : i32, message = "bqk,bkd->bqd"}> : () -> ()
    %cst_20 = arith.constant dense<0.000000e+00> : vector<4x16x32xf32>
    %65 = tpu.matmul %64, %52, %cst_20 {dimension_numbers = #tpu.dot_dimension_numbers<[2], [1], [1], [2], [0, 0, 0, 1, 1, 2], [0], [0]>} : vector<4x16x16xbf16>, vector<4x16x32xbf16>, vector<4x16x32xf32> -> vector<4x16x32xf32>
    "tpu.trace_stop"() : () -> ()
    %66 = vector.extract_strided_slice %65 {offsets = [0, 0, 0], sizes = [1, 16, 32], strides = [1, 1, 1]} : vector<4x16x32xf32> to vector<1x16x32xf32>
    %67 = vector.shape_cast %66 : vector<1x16x32xf32> to vector<16x32xf32>
    %68 = vector.extract_strided_slice %65 {offsets = [1, 0, 0], sizes = [1, 16, 32], strides = [1, 1, 1]} : vector<4x16x32xf32> to vector<1x16x32xf32>
    %69 = vector.shape_cast %68 : vector<1x16x32xf32> to vector<16x32xf32>
    %70 = vector.extract_strided_slice %65 {offsets = [2, 0, 0], sizes = [1, 16, 32], strides = [1, 1, 1]} : vector<4x16x32xf32> to vector<1x16x32xf32>
    %71 = vector.shape_cast %70 : vector<1x16x32xf32> to vector<16x32xf32>
    %72 = vector.extract_strided_slice %65 {offsets = [3, 0, 0], sizes = [1, 16, 32], strides = [1, 1, 1]} : vector<4x16x32xf32> to vector<1x16x32xf32>
    %73 = vector.shape_cast %72 : vector<1x16x32xf32> to vector<16x32xf32>
    %74 = tpu.concatenate %67, %69, %71, %73 in 1 : vector<16x32xf32>, vector<16x32xf32>, vector<16x32xf32>, vector<16x32xf32> -> vector<16x128xf32>
    %75 = vector.shape_cast %74 : vector<16x128xf32> to vector<1x16x128xf32>
    %c0_21 = arith.constant 0 : index
    %c0_22 = arith.constant 0 : index
    %c0_23 = arith.constant 0 : index
    %76 = vector.load %arg8[%c0_21, %c0_22, %c0_23] : memref<1x16x128xf32, #tpu.memory_space<vmem>>, vector<1x16x128xf32>
    tpu.vector_store %arg8[%c0_21, %c0_22, %c0_23], %75 {strides = array<i32>} : memref<1x16x128xf32, #tpu.memory_space<vmem>>, vector<1x16x128xf32>,
    return
  }
  func.func @transform_0(%arg0: i32) -> (i32, i32, i32) {
    %c0_i32 = arith.constant 0 : i32
    %c0_i32_0 = arith.constant 0 : i32
    %c0_i32_1 = arith.constant 0 : i32
    return %arg0, %c0_i32, %c0_i32_0 : i32, i32, i32
  }
  func.func @transform_1(%arg0: i32) -> (i32, i32) {
    %c0_i32 = arith.constant 0 : i32
    %c0_i32_0 = arith.constant 0 : i32
    %c0_i32_1 = arith.constant 0 : i32
    return %c0_i32, %c0_i32_0 : i32, i32
  }
  func.func @transform_2(%arg0: i32) -> (i32, i32) {
    %c0_i32 = arith.constant 0 : i32
    %c0_i32_0 = arith.constant 0 : i32
    %c0_i32_1 = arith.constant 0 : i32
    return %c0_i32, %c0_i32_0 : i32, i32
  }
  func.func @transform_3(%arg0: i32) -> (i32, i32) {
    %c0_i32 = arith.constant 0 : i32
    %c0_i32_0 = arith.constant 0 : i32
    %c0_i32_1 = arith.constant 0 : i32
    return %c0_i32, %c0_i32_0 : i32, i32
  }
  func.func @transform_4(%arg0: i32) -> (i32, i32) {
    %c0_i32 = arith.constant 0 : i32
    %c0_i32_0 = arith.constant 0 : i32
    %c0_i32_1 = arith.constant 0 : i32
    return %c0_i32, %c0_i32_0 : i32, i32
  }
  func.func @transform_5(%arg0: i32) -> (i32, i32) {
    %c0_i32 = arith.constant 0 : i32
    %c0_i32_0 = arith.constant 0 : i32
    %c0_i32_1 = arith.constant 0 : i32
    return %c0_i32, %c0_i32_0 : i32, i32
  }
  func.func @transform_6(%arg0: i32) -> (i32, i32) {
    %c0_i32 = arith.constant 0 : i32
    %c0_i32_0 = arith.constant 0 : i32
    %c0_i32_1 = arith.constant 0 : i32
    return %c0_i32, %c0_i32_0 : i32, i32
  }
  func.func @transform_7(%arg0: i32) -> (i32, i32, i32) {
    %c0_i32 = arith.constant 0 : i32
    %c0_i32_0 = arith.constant 0 : i32
    %c0_i32_1 = arith.constant 0 : i32
    return %arg0, %c0_i32, %c0_i32_0 : i32, i32, i32
  }
}

module attributes {stable_mosaic.version = 11 : i64} {
  func.func @_self_attention_kernel(%arg0: i32, %arg1: memref<1x16x128xf32, #tpu.memory_space<vmem>>, %arg2: memref<128x128xf32, #tpu.memory_space<vmem>>, %arg3: memref<1x128xf32, #tpu.memory_space<vmem>>, %arg4: memref<128x128xf32, #tpu.memory_space<vmem>>, %arg5: memref<1x128xf32, #tpu.memory_space<vmem>>, %arg6: memref<128x128xf32, #tpu.memory_space<vmem>>, %arg7: memref<1x128xf32, #tpu.memory_space<vmem>>, %arg8: memref<1x16x128xf32, #tpu.memory_space<vmem>>) attributes {dimension_semantics = [#tpu.dimension_semantics<parallel>], iteration_bounds = array<i64: 2>, scalar_prefetch = 0 : i64, scratch_operands = 0 : i64, tpu.core_type = #tpu.core_type<tc>, window_params = [{transform_indices = @transform_0, window_bounds = array<i64: 1, 16, 128>}, {pipeline_mode = #tpu.pipeline_mode<synchronous>, transform_indices = @transform_1, window_bounds = array<i64: 128, 128>}, {pipeline_mode = #tpu.pipeline_mode<synchronous>, transform_indices = @transform_2, window_bounds = array<i64: 1, 128>}, {pipeline_mode = #tpu.pipeline_mode<synchronous>, transform_indices = @transform_3, window_bounds = array<i64: 128, 128>}, {pipeline_mode = #tpu.pipeline_mode<synchronous>, transform_indices = @transform_4, window_bounds = array<i64: 1, 128>}, {pipeline_mode = #tpu.pipeline_mode<synchronous>, transform_indices = @transform_5, window_bounds = array<i64: 128, 128>}, {pipeline_mode = #tpu.pipeline_mode<synchronous>, transform_indices = @transform_6, window_bounds = array<i64: 1, 128>}, {transform_indices = @transform_7, window_bounds = array<i64: 1, 16, 128>}]} {
    %c0 = arith.constant 0 : index
    %c0_0 = arith.constant 0 : index
    %c0_1 = arith.constant 0 : index
    %0 = vector.load %arg1[%c0, %c0_0, %c0_1] : memref<1x16x128xf32, #tpu.memory_space<vmem>>, vector<1x16x128xf32>
    %1 = vector.shape_cast %0 : vector<1x16x128xf32> to vector<16x128xf32>
    %2 = arith.truncf %1 : vector<16x128xf32> to vector<16x128xbf16>
    %c0_2 = arith.constant 0 : index
    %c0_3 = arith.constant 0 : index
    %3 = vector.load %arg2[%c0_2, %c0_3] : memref<128x128xf32, #tpu.memory_space<vmem>>, vector<128x128xf32>
    %4 = arith.truncf %3 : vector<128x128xf32> to vector<128x128xbf16>
    %cst = arith.constant dense<0.000000e+00> : vector<16x128xf32>
    %5 = tpu.matmul %2, %4, %cst {dimension_numbers = #tpu.dot_dimension_numbers<[1], [0], [0], [1], [0, 0, 1, 1], [], []>} : vector<16x128xbf16>, vector<128x128xbf16>, vector<16x128xf32> -> vector<16x128xf32>
    %c0_4 = arith.constant 0 : index
    %c0_5 = arith.constant 0 : index
    %6 = vector.load %arg3[%c0_4, %c0_5] : memref<1x128xf32, #tpu.memory_space<vmem>>, vector<1x128xf32>
    %7 = vector.broadcast %6 : vector<1x128xf32> to vector<16x128xf32>
    %8 = arith.addf %5, %7 : vector<16x128xf32>
    %cst_6 = arith.constant 0.176776692 : f32
    %9 = vector.broadcast %cst_6 : f32 to vector<16x128xf32>
    %10 = arith.mulf %8, %9 : vector<16x128xf32>
    %c0_7 = arith.constant 0 : index
    %c0_8 = arith.constant 0 : index
    %11 = vector.load %arg4[%c0_7, %c0_8] : memref<128x128xf32, #tpu.memory_space<vmem>>, vector<128x128xf32>
    %12 = arith.truncf %11 : vector<128x128xf32> to vector<128x128xbf16>
    %cst_9 = arith.constant dense<0.000000e+00> : vector<16x128xf32>
    %13 = tpu.matmul %2, %12, %cst_9 {dimension_numbers = #tpu.dot_dimension_numbers<[1], [0], [0], [1], [0, 0, 1, 1], [], []>} : vector<16x128xbf16>, vector<128x128xbf16>, vector<16x128xf32> -> vector<16x128xf32>
    %c0_10 = arith.constant 0 : index
    %c0_11 = arith.constant 0 : index
    %14 = vector.load %arg5[%c0_10, %c0_11] : memref<1x128xf32, #tpu.memory_space<vmem>>, vector<1x128xf32>
    %15 = vector.broadcast %14 : vector<1x128xf32> to vector<16x128xf32>
    %16 = arith.addf %13, %15 : vector<16x128xf32>
    %c0_12 = arith.constant 0 : index
    %c0_13 = arith.constant 0 : index
    %17 = vector.load %arg6[%c0_12, %c0_13] : memref<128x128xf32, #tpu.memory_space<vmem>>, vector<128x128xf32>
    %18 = arith.truncf %17 : vector<128x128xf32> to vector<128x128xbf16>
    %cst_14 = arith.constant dense<0.000000e+00> : vector<16x128xf32>
    %19 = tpu.matmul %2, %18, %cst_14 {dimension_numbers = #tpu.dot_dimension_numbers<[1], [0], [0], [1], [0, 0, 1, 1], [], []>} : vector<16x128xbf16>, vector<128x128xbf16>, vector<16x128xf32> -> vector<16x128xf32>
    %c0_15 = arith.constant 0 : index
    %c0_16 = arith.constant 0 : index
    %20 = vector.load %arg7[%c0_15, %c0_16] : memref<1x128xf32, #tpu.memory_space<vmem>>, vector<1x128xf32>
    %21 = vector.broadcast %20 : vector<1x128xf32> to vector<16x128xf32>
    %22 = arith.addf %19, %21 : vector<16x128xf32>
    %23 = vector.extract_strided_slice %10 {offsets = [0, 0], sizes = [16, 32], strides = [1, 1]} : vector<16x128xf32> to vector<16x32xf32>
    %24 = vector.extract_strided_slice %10 {offsets = [0, 32], sizes = [16, 32], strides = [1, 1]} : vector<16x128xf32> to vector<16x32xf32>
    %25 = vector.extract_strided_slice %10 {offsets = [0, 64], sizes = [16, 32], strides = [1, 1]} : vector<16x128xf32> to vector<16x32xf32>
    %26 = vector.extract_strided_slice %10 {offsets = [0, 96], sizes = [16, 32], strides = [1, 1]} : vector<16x128xf32> to vector<16x32xf32>
    %27 = vector.shape_cast %23 : vector<16x32xf32> to vector<1x16x32xf32>
    %28 = vector.shape_cast %24 : vector<16x32xf32> to vector<1x16x32xf32>
    %29 = vector.shape_cast %25 : vector<16x32xf32> to vector<1x16x32xf32>
    %30 = vector.shape_cast %26 : vector<16x32xf32> to vector<1x16x32xf32>
    %31 = tpu.concatenate %27, %28, %29, %30 in 0 : vector<1x16x32xf32>, vector<1x16x32xf32>, vector<1x16x32xf32>, vector<1x16x32xf32> -> vector<4x16x32xf32>
    %32 = arith.truncf %31 : vector<4x16x32xf32> to vector<4x16x32xbf16>
    %33 = vector.extract_strided_slice %16 {offsets = [0, 0], sizes = [16, 32], strides = [1, 1]} : vector<16x128xf32> to vector<16x32xf32>
    %34 = vector.extract_strided_slice %16 {offsets = [0, 32], sizes = [16, 32], strides = [1, 1]} : vector<16x128xf32> to vector<16x32xf32>
    %35 = vector.extract_strided_slice %16 {offsets = [0, 64], sizes = [16, 32], strides = [1, 1]} : vector<16x128xf32> to vector<16x32xf32>
    %36 = vector.extract_strided_slice %16 {offsets = [0, 96], sizes = [16, 32], strides = [1, 1]} : vector<16x128xf32> to vector<16x32xf32>
    %37 = vector.shape_cast %33 : vector<16x32xf32> to vector<1x16x32xf32>
    %38 = vector.shape_cast %34 : vector<16x32xf32> to vector<1x16x32xf32>
    %39 = vector.shape_cast %35 : vector<16x32xf32> to vector<1x16x32xf32>
    %40 = vector.shape_cast %36 : vector<16x32xf32> to vector<1x16x32xf32>
    %41 = tpu.concatenate %37, %38, %39, %40 in 0 : vector<1x16x32xf32>, vector<1x16x32xf32>, vector<1x16x32xf32>, vector<1x16x32xf32> -> vector<4x16x32xf32>
    %42 = arith.truncf %41 : vector<4x16x32xf32> to vector<4x16x32xbf16>
    %43 = vector.extract_strided_slice %22 {offsets = [0, 0], sizes = [16, 32], strides = [1, 1]} : vector<16x128xf32> to vector<16x32xf32>
    %44 = vector.extract_strided_slice %22 {offsets = [0, 32], sizes = [16, 32], strides = [1, 1]} : vector<16x128xf32> to vector<16x32xf32>
    %45 = vector.extract_strided_slice %22 {offsets = [0, 64], sizes = [16, 32], strides = [1, 1]} : vector<16x128xf32> to vector<16x32xf32>
    %46 = vector.extract_strided_slice %22 {offsets = [0, 96], sizes = [16, 32], strides = [1, 1]} : vector<16x128xf32> to vector<16x32xf32>
    %47 = vector.shape_cast %43 : vector<16x32xf32> to vector<1x16x32xf32>
    %48 = vector.shape_cast %44 : vector<16x32xf32> to vector<1x16x32xf32>
    %49 = vector.shape_cast %45 : vector<16x32xf32> to vector<1x16x32xf32>
    %50 = vector.shape_cast %46 : vector<16x32xf32> to vector<1x16x32xf32>
    %51 = tpu.concatenate %47, %48, %49, %50 in 0 : vector<1x16x32xf32>, vector<1x16x32xf32>, vector<1x16x32xf32>, vector<1x16x32xf32> -> vector<4x16x32xf32>
    %52 = arith.truncf %51 : vector<4x16x32xf32> to vector<4x16x32xbf16>
    "tpu.trace_start"() <{level = 10 : i32, message = "bqd,bkd->bqk"}> : () -> ()
    %cst_17 = arith.constant dense<0.000000e+00> : vector<4x16x16xf32>
    %53 = tpu.matmul %32, %42, %cst_17 {dimension_numbers = #tpu.dot_dimension_numbers<[2], [2], [1], [1], [0, 0, 0, 1, 1, 1], [0], [0]>} : vector<4x16x32xbf16>, vector<4x16x32xbf16>, vector<4x16x16xf32> -> vector<4x16x16xf32>
    "tpu.trace_stop"() : () -> ()
    %cst_18 = arith.constant dense<0xFF800000> : vector<4x16xf32>
    %54 = vector.multi_reduction <maximumf>, %53, %cst_18 [2] : vector<4x16x16xf32> to vector<4x16xf32>
    %55 = vector.shape_cast %54 : vector<4x16xf32> to vector<4x16x1xf32>
    %56 = vector.broadcast %55 : vector<4x16x1xf32> to vector<4x16x16xf32>
    %57 = arith.subf %53, %56 : vector<4x16x16xf32>
    %58 = math.exp %57 : vector<4x16x16xf32>
    %cst_19 = arith.constant dense<0.000000e+00> : vector<4x16xf32>
    %59 = vector.multi_reduction <add>, %58, %cst_19 [2] : vector<4x16x16xf32> to vector<4x16xf32>
    %60 = vector.shape_cast %59 : vector<4x16xf32> to vector<4x16x1xf32>
    %61 = tpu.reciprocal %60 {approx = true} : vector<4x16x1xf32> -> vector<4x16x1xf32>
    %62 = vector.broadcast %61 : vector<4x16x1xf32> to vector<4x16x16xf32>
    %63 = arith.mulf %58, %62 : vector<4x16x16xf32>
    %64 = arith.truncf %63 : vector<4x16x16xf32> to vector<4x16x16xbf16>
    "tpu.trace_start"() <{level = 10 : i32, message = "bqk,bkd->bqd"}> : () -> ()
    %cst_20 = arith.constant dense<0.000000e+00> : vector<4x16x32xf32>
    %65 = tpu.matmul %64, %52, %cst_20 {dimension_numbers = #tpu.dot_dimension_numbers<[2], [1], [1], [2], [0, 0, 0, 1, 1, 2], [0], [0]>} : vector<4x16x16xbf16>, vector<4x16x32xbf16>, vector<4x16x32xf32> -> vector<4x16x32xf32>
    "tpu.trace_stop"() : () -> ()
    %66 = vector.extract_strided_slice %65 {offsets = [0, 0, 0], sizes = [1, 16, 32], strides = [1, 1, 1]} : vector<4x16x32xf32> to vector<1x16x32xf32>
    %67 = vector.shape_cast %66 : vector<1x16x32xf32> to vector<16x32xf32>
    %68 = vector.extract_strided_slice %65 {offsets = [1, 0, 0], sizes = [1, 16, 32], strides = [1, 1, 1]} : vector<4x16x32xf32> to vector<1x16x32xf32>
    %69 = vector.shape_cast %68 : vector<1x16x32xf32> to vector<16x32xf32>
    %70 = vector.extract_strided_slice %65 {offsets = [2, 0, 0], sizes = [1, 16, 32], strides = [1, 1, 1]} : vector<4x16x32xf32> to vector<1x16x32xf32>
    %71 = vector.shape_cast %70 : vector<1x16x32xf32> to vector<16x32xf32>
    %72 = vector.extract_strided_slice %65 {offsets = [3, 0, 0], sizes = [1, 16, 32], strides = [1, 1, 1]} : vector<4x16x32xf32> to vector<1x16x32xf32>
    %73 = vector.shape_cast %72 : vector<1x16x32xf32> to vector<16x32xf32>
    %74 = tpu.concatenate %67, %69, %71, %73 in 1 : vector<16x32xf32>, vector<16x32xf32>, vector<16x32xf32>, vector<16x32xf32> -> vector<16x128xf32>
    %75 = vector.shape_cast %74 : vector<16x128xf32> to vector<1x16x128xf32>
    %c0_21 = arith.constant 0 : index
    %c0_22 = arith.constant 0 : index
    %c0_23 = arith.constant 0 : index
    %76 = vector.load %arg8[%c0_21, %c0_22, %c0_23] : memref<1x16x128xf32, #tpu.memory_space<vmem>>, vector<1x16x128xf32>
    tpu.vector_store %arg8[%c0_21, %c0_22, %c0_23], %75 {strides = array<i32>} : memref<1x16x128xf32, #tpu.memory_space<vmem>>, vector<1x16x128xf32>,
    return
  }
  func.func @transform_0(%arg0: i32) -> (i32, i32, i32) {
    %c0_i32 = arith.constant 0 : i32
    %c0_i32_0 = arith.constant 0 : i32
    %c0_i32_1 = arith.constant 0 : i32
    return %arg0, %c0_i32, %c0_i32_0 : i32, i32, i32
  }
  func.func @transform_1(%arg0: i32) -> (i32, i32) {
    %c0_i32 = arith.constant 0 : i32
    %c0_i32_0 = arith.constant 0 : i32
    %c0_i32_1 = arith.constant 0 : i32
    return %c0_i32, %c0_i32_0 : i32, i32
  }
  func.func @transform_2(%arg0: i32) -> (i32, i32) {
    %c0_i32 = arith.constant 0 : i32
    %c0_i32_0 = arith.constant 0 : i32
    %c0_i32_1 = arith.constant 0 : i32
    return %c0_i32, %c0_i32_0 : i32, i32
  }
  func.func @transform_3(%arg0: i32) -> (i32, i32) {
    %c0_i32 = arith.constant 0 : i32
    %c0_i32_0 = arith.constant 0 : i32
    %c0_i32_1 = arith.constant 0 : i32
    return %c0_i32, %c0_i32_0 : i32, i32
  }
  func.func @transform_4(%arg0: i32) -> (i32, i32) {
    %c0_i32 = arith.constant 0 : i32
    %c0_i32_0 = arith.constant 0 : i32
    %c0_i32_1 = arith.constant 0 : i32
    return %c0_i32, %c0_i32_0 : i32, i32
  }
  func.func @transform_5(%arg0: i32) -> (i32, i32) {
    %c0_i32 = arith.constant 0 : i32
    %c0_i32_0 = arith.constant 0 : i32
    %c0_i32_1 = arith.constant 0 : i32
    return %c0_i32, %c0_i32_0 : i32, i32
  }
  func.func @transform_6(%arg0: i32) -> (i32, i32) {
    %c0_i32 = arith.constant 0 : i32
    %c0_i32_0 = arith.constant 0 : i32
    %c0_i32_1 = arith.constant 0 : i32
    return %c0_i32, %c0_i32_0 : i32, i32
  }
  func.func @transform_7(%arg0: i32) -> (i32, i32, i32) {
    %c0_i32 = arith.constant 0 : i32
    %c0_i32_0 = arith.constant 0 : i32
    %c0_i32_1 = arith.constant 0 : i32
    return %arg0, %c0_i32, %c0_i32_0 : i32, i32, i32
  }
}

</mosaic_0001>

<bundles_post_ra>
// kernel: tpu_custom_call.1
= control target key start
LH: loop header
LB: loop body
LE: loop exit
PB: predicated region body
PF: predicated region fallthrough
CT: control target
= control target key end

     0   :  { %12 = vsyncpa [#allocation3], 0  ;;  %s2230_s0 = inlined_call_operand.hbm [shape: f32[2,16,128], index: 0, kind: input, shape index: {}]   ;;  %s2231_s1 = inlined_call_operand.hbm [shape: f32[128,128], index: 1, kind: input, shape index: {}]   ;;  %s2232_s2 = inlined_call_operand.vmem [shape: f32[1,128], index: 2, kind: input, shape index: {}]   ;;  %s2233_s3 = inlined_call_operand.hbm [shape: f32[128,128], index: 3, kind: input, shape index: {}]   ;;  %s2234_s4 = inlined_call_operand.vmem [shape: f32[1,128], index: 4, kind: input, shape index: {}]   ;;  %s2235_s5 = inlined_call_operand.hbm [shape: f32[128,128], index: 5, kind: input, shape index: {}]   ;;  %s2236_s6 = inlined_call_operand.vmem [shape: f32[1,128], index: 6, kind: input, shape index: {}]   ;;  %s2237_s7 = inlined_call_operand.hbm [shape: f32[2,16,128], index: 7, kind: output, shape index: {}]  }
   0x1   :  { %14 = vsyncpa [#allocation3 + $0x1], 0 }
   0x2   :  { %15 = vsyncpa [#allocation6], 0 }
   0x3   :  { %16 = vsyncpa [#allocation9], 0 }
   0x4   :  { %17 = vsyncpa [#allocation4], 0 }
   0x5   :  { %19 = vsyncpa [#allocation4 + $0x1], 0  ;;  %s1834_s24 = smov 0   ;;  %s1836_s25 = smov 0  }
   0x6   :  { %s1838_s26 = smov 0   ;;  %s1840_s27 = smov 0  }
   0x7 LB: > { %s1855_s28 = sadd.s32 4294967295, %s1778_s27   ;;  %s1243_s29 = sadd.s32 4294967294, %s1778_s27   ;;  %s1778_s27 = sphi %s1840_s27, %s2263_s27   ;;  %s1774_s26 = sphi %s1838_s26, %s2262_s26   ;;  %s1770_s25 = sphi %s1836_s25, %s2261_s25   ;;  %s1766_s24 = sphi %s1834_s24, %s2260_s24  }
   0x8   : > { %p45_p0 = scmp.ne.s32.totalorder %s1770_s25, %s1766_s24  ;;  %p2238_p1 = scmp.eq.s32.totalorder %s1855_s28, 0 }
   0x9   : > { %p201_p3 = scmp.eq.s32.totalorder %s1243_s29, 1  ;;  %p1244_p5 = scmp.ge.s32.totalorder %s1778_s27, 1 }
   0xa   : > { %p1864_p4 = por %p2238_p1, %p45_p0  ;;  %p208_p7 = scmp.lt.s32.totalorder %s1778_s27, 3 }
   0xb   : > { %p1869_p6 = por %p201_p3, %p45_p0  ;;  %s1780_s10 = smov [#allocation5]  }
   0xc   : > { %s2242_s30 = scalar_select %p1864_p4, 1, 0 }
   0xd   : > { %s2243_s8 = scalar_select %p1869_p6, 1, 0 }
   0xe   : > { %p1874_p8 = pnand %p1244_p5, %p208_p7  ;;  %s220_s11 = sshll.u32 %s1780_s10, 4  ;;  %s1878_s11 = int_to_ptr.vmem [resolvable:$true] %s220_s11 }
   0xf   : > { %2244 = sst [smem:[#allocation15_spill]] %s2243_s8  ;;  %s1781_s13 = smov [#allocation7]  }
  0x10   : > { %s2245_s9 = scalar_select %p1874_p8, 1, 0 }
  0x11   : > { %p1443_p9 = pneg %p1874_p8  ;;  %s236_s14 = sshll.u32 %s1781_s13, 4  ;;  %s1889_s14 = int_to_ptr.vmem [resolvable:$true] %s236_s14 }
  0x12   : > { %s1782_s15 = smov [#allocation8]   ;;  %s1590_s19 = scalar_lea.hbm %s2231_s1, 2048 }
  0x13   : > { %p1885_p11 = pnand %p1443_p9, %p2238_p1  ;;  %s1891_s16 = sshll.u32 %s1782_s15, 4  ;;  %s253_s16 = int_to_ptr.vmem [resolvable:$true] %s1891_s16 }
  0x14   : > { %p1591_p12 = scmp.ne.s32.totalorder %s2231_s1, %s1590_s19  ;;  %p1597_p5 = scmp.lt.u32.totalorder %s1590_s19, %s2231_s1 }
  0x15   : > { %p1901_p13 = pneg %p1885_p11 }
  0x17   : > { %p1593_p0 = pnand %p1901_p13, %p1591_p12 }
  0x19   : > { %p1594_p3 = pneg %p1593_p0 }
  0x1b   : > { %p1599_p7 = pnand %p1597_p5, %p1594_p3 }
  0x1d   : > { %1602 = shalt.err (!%p1599_p7)
}
  0x1e   : > { %s1603_s10 = scalar_lea.vmem %s1878_s11, 2048  ;;  %p1611_p2 = scmp.lt.s32.totalorder %s1878_s11, %s1878_s11 }
  0x1f   : > { %p1604_p9 = scmp.ne.s32.totalorder %s1878_s11, %s1603_s10  ;;  %p1612_p6 = scmp.lt.s32.totalorder %s1603_s10, %s1603_s10 }
  0x21   : > { %p1606_p10 = pnand %p1604_p9, %p1901_p13  ;;  %p1613_p12 = por %p1612_p6, %p1611_p2 }
  0x23   : > { %p1607_p1 = pneg %p1606_p10 }
  0x25   : > { %p1614_p0 = pnand %p1613_p12, %p1607_p1 }
  0x27   : > { %1617 = shalt.err (!%p1614_p0)
}
  0x28   : > { %s1783_s13 = smov 128   ;;  %s1784_s15 = smov 8  }
  0x29   : > { %1446 = dma.hbm_to_vmem [thread:$0]  (!%p1885_p11), %s2231_s1, 2048, %s1878_s11, [#allocation6], %s1783_s13, %s1783_s13, %s1784_s15  }
  0x2a   : > { %s1618_s21 = scalar_lea.hbm %s2233_s3, 2048 }
  0x2b   : > { %p1619_p1 = scmp.ne.s32.totalorder %s2233_s3, %s1618_s21  ;;  %p1625_p10 = scmp.lt.u32.totalorder %s1618_s21, %s2233_s3 }
  0x2d   : > { %p1621_p2 = pnand %p1619_p1, %p1901_p13 }
  0x2f   : > { %p1622_p6 = pneg %p1621_p2 }
  0x31   : > { %p1627_p3 = pnand %p1625_p10, %p1622_p6 }
  0x33   : > { %1630 = shalt.err (!%p1627_p3)
}
  0x34   : > { %s1631_s11 = scalar_lea.vmem %s1889_s14, 2048  ;;  %p1639_p12 = scmp.lt.s32.totalorder %s1889_s14, %s1889_s14 }
  0x35   : > { %p1632_p5 = scmp.ne.s32.totalorder %s1889_s14, %s1631_s11  ;;  %p1640_p0 = scmp.lt.s32.totalorder %s1631_s11, %s1631_s11 }
  0x37   : > { %p1634_p7 = pnand %p1632_p5, %p1901_p13  ;;  %p1641_p1 = por %p1640_p0, %p1639_p12 }
  0x39   : > { %p1635_p9 = pneg %p1634_p7 }
  0x3b   : > { %p1642_p2 = pnand %p1641_p1, %p1635_p9 }
  0x3d   : > { %1645 = shalt.err (!%p1642_p2)
}
  0x3e   : > { %1449 = dma.hbm_to_vmem [thread:$0]  (!%p1885_p11), %s2233_s3, 2048, %s1889_s14, [#allocation6], %s1783_s13, %s1783_s13, %s1784_s15  }
  0x3f   : > { %s1646_s20 = scalar_lea.hbm %s2235_s5, 2048 }
  0x40   : > { %p1647_p6 = scmp.ne.s32.totalorder %s2235_s5, %s1646_s20  ;;  %p1653_p5 = scmp.lt.u32.totalorder %s1646_s20, %s2235_s5 }
  0x42   : > { %p1649_p10 = pnand %p1647_p6, %p1901_p13 }
  0x44   : > { %p1650_p3 = pneg %p1649_p10 }
  0x46   : > { %p1655_p7 = pnand %p1653_p5, %p1650_p3 }
  0x48   : > { %1658 = shalt.err (!%p1655_p7)
}
  0x49   : > { %s1659_s11 = scalar_lea.vmem %s253_s16, 2048  ;;  %p1667_p1 = scmp.lt.s32.totalorder %s253_s16, %s253_s16 }
  0x4a   : > { %p1660_p9 = scmp.ne.s32.totalorder %s253_s16, %s1659_s11  ;;  %p1668_p2 = scmp.lt.s32.totalorder %s1659_s11, %s1659_s11 }
  0x4c   : > { %p1662_p12 = pnand %p1660_p9, %p1901_p13  ;;  %p1669_p4 = por %p1668_p2, %p1667_p1 }
  0x4e   : > { %p1663_p0 = pneg %p1662_p12 }
  0x50   : > { %p1670_p8 = pnand %p1669_p4, %p1663_p0 }
  0x52   : > { %1673 = shalt.err (!%p1670_p8)
}
  0x53   : > { %1452 = dma.hbm_to_vmem [thread:$0]  (!%p1885_p11), %s2235_s5, 2048, %s253_s16, [#allocation9], %s1783_s13, %s1783_s13, %s1784_s15  }
  0x54   : > { %s1974_s22 = sadd.s32 1, %s1778_s27   ;;  %s32_s17 = sadd.s32 1, %s1774_s26 }
  0x55   : > { %s29_s12 = ssub.s32 %s1778_s27, %s1974_s22  ;;  %p39_p8 = scmp.ne.s32.totalorder %s1774_s26, %s1770_s25 }
  0x56   : > { %p30_p4 = scmp.eq.s32.totalorder %s29_s12, 0  ;;  %p40_p13 = scmp.eq.s32.totalorder %s1778_s27, 0 }
  0x57   : > { %p1464_p6 = scmp.lt.s32.totalorder %s1778_s27, 2  ;;  %p2248_p3 = scmp.eq.s32.totalorder %s1855_s28, 1 }
  0x58   : > { %s1984_s18 = scalar_select %p30_p4, %s1774_s26, %s32_s17  }
  0x59   : > { %p41_p10 = por %p40_p13, %p39_p8  ;;  %p1988_p5 = por %p2248_p3, %p39_p8 }
  0x5a   : > { %s269_s20 = sand.u32 1, %s1774_s26   ;;  %s1274_s21 = sshll.u32 %s1778_s27, 8 }
  0x5b   : > { %s1249_s16 = sshll.u32 %s269_s20, 4  ;;  %s1997_s10 = scalar_lea.hbm %s2230_s0, %s1274_s21 }
  0x5c   : > { %s273_s11 = scalar_lea.vmem [#allocation2], %s1249_s16  ;;  %p1999_p11 = pnand %p1464_p6, %p41_p10 }
  0x5d   : > { %s280_s14 = sshll.u32 %s273_s11, 4  ;;  %s2005_s12 = scalar_lea.sflag [#allocation3], %s269_s20  ;;  %s2003_s14 = int_to_ptr.vmem [resolvable:$true] %s280_s14 }
  0x5e   : > { %s1674_s17 = scalar_lea.hbm %s1997_s10, 256  ;;  %p1676_p9 = pneg %p1999_p11 }
  0x5f   : > { %p1675_p7 = scmp.ne.s32.totalorder %s1997_s10, %s1674_s17  ;;  %s1679_s23 = scalar_lea.hbm %s2230_s0, 512 }
  0x60   : > { %p1680_p1 = scmp.lt.u32.totalorder %s1997_s10, %s2230_s0  ;;  %p1681_p2 = scmp.lt.u32.totalorder %s1679_s23, %s1674_s17 }
  0x61   : > { %p1677_p12 = pnand %p1676_p9, %p1675_p7  ;;  %p1683_p8 = scmp.lt.u32.totalorder %s1674_s17, %s1997_s10 }
  0x62   : > { %p1682_p4 = por %p1681_p2, %p1680_p1 }
  0x63   : > { %p1678_p0 = pneg %p1677_p12 }
  0x64   : > { %p1684_p13 = por %p1683_p8, %p1682_p4 }
  0x66   : > { %p1685_p6 = pnand %p1684_p13, %p1678_p0 }
  0x68   : > { %1688 = shalt.err (!%p1685_p6)
}
  0x69   : > { %s1689_s20 = scalar_lea.vmem %s2003_s14, 256  ;;  %s1785_s21 = smov [#allocation2]  }
  0x6a   : > { %p1690_p10 = scmp.ne.s32.totalorder %s2003_s14, %s1689_s20  ;;  %s1694_s16 = sshll.u32 %s1785_s21, 4  ;;  %s1695_s16 = int_to_ptr.vmem [resolvable:$false] %s1694_s16 }
  0x6b   : > { %s1696_s29 = scalar_lea.vmem %s1695_s16, 512  ;;  %p1697_p12 = scmp.lt.s32.totalorder %s2003_s14, %s1695_s16 }
  0x6c   : > { %p1692_p3 = pnand %p1690_p10, %p1676_p9  ;;  %p1698_p1 = scmp.lt.s32.totalorder %s1696_s29, %s1689_s20 }
  0x6e   : > { %p1693_p7 = pneg %p1692_p3  ;;  %p1699_p2 = por %p1698_p1, %p1697_p12 }
  0x70   : > { %p1700_p4 = pnand %p1699_p2, %p1693_p7 }
  0x72   : > { %1703 = shalt.err (!%p1700_p4)
}
  0x73   : > { %1456 = dma.hbm_to_vmem [thread:$0]  (!%p1999_p11), %s1997_s10, 256, %s2003_s14, %s2005_s12, %s1783_s13, %s1783_s13, %s1784_s15  }
  0x74   : > { %p2251_p9 = scmp.ne.s32.totalorder %s2245_s9, 0 }
  0x75   : > { %s2039_s17 = sand.u32 (!%p2251_p9), 1, %s1770_s25   ;;  %p2252_p0 = scmp.ne.s32.totalorder (!%p2251_p9), %s2242_s30, 0 }
  0x76   : > { %292 = sbr.rel (%p2251_p9) target bundleno = 1403 (0x57b), region = 48  ;;  %s1253_s23 = sshll.u32 (!%p2251_p9), %s2039_s17, 4 }
  0x77   : > { %s295_s11 = scalar_lea.sflag (!%p2251_p9), [#allocation3], %s2039_s17  ;;  %s2045_s8 = scalar_lea.vmem (!%p2251_p9), [#allocation2], %s1253_s23 }
  0x7d   : > { %1749 = dma.done.wait (%p2252_p0), %s295_s11, 256  }
  0x7e   : > { %1751 = vsyncadd (%p2252_p0), %s295_s11, 4294967040  ;;  %p2253_p11 = scmp.eq.s32.totalorder %s1855_s28, 0 }
  0x80   : > { %1753 = dma.done.wait (%p2253_p11), [#allocation6], 4096   ;;  %p2254_p8 = pmov %p2253_p11 }
  0x82   : > { %1755 = vsyncadd (%p2254_p8), [#allocation6], 4294963200  ;;  %p2255_p13 = pmov %p2254_p8 }
  0x83   : > { %p2256_p6 = pmov %p2254_p8 }
  0x84   : > { %1757 = dma.done.wait (%p2255_p13), [#allocation9], 2048  }
  0x85   : > { %1759 = vsyncadd (%p2256_p6), [#allocation9], 4294965248  ;;  %v1786_v0 = vmov 0.0   ;;  %vm1787_vm0 = vmmov 0   ;;  %v419_v1 = vld [vmem:[#allocation7] sm:$0xff]  ;;  %v420_v2 = vld [vmem:[#allocation7 + $0x8] sm:$0xff] }
  0x86   : > { %1339 = vmatprep.subr.bf16.mxu1 %v1786_v0  ;;  %1319 = vmatprep.subr.bf16.mxu0 %v1786_v0  ;;  %v345_v3 = vld [vmem:[#allocation5] sm:$0xff]  ;;  %v435_v4 = vpack.c.bf16 %v420_v2, %v419_v1  ;;  %v346_v5 = vld [vmem:[#allocation5 + $0x8] sm:$0xff]  ;;  %v421_v6 = vld [vmem:[#allocation7 + $0x10] sm:$0xff]  ;;  %vm635_vm1 = vcmask 261120   ;;  %s1788_s10 = smov 64   ;;  %s1789_s14 = smov 96  }
  0x87   : > { %1355 = vmatprep.mubr.msk.bf16.mxu1 %vm1787_vm0, %v1786_v0  ;;  %1335 = vmatprep.mubr.msk.bf16.mxu0 %vm1787_vm0, %v1786_v0  ;;  %v422_v7 = vld [vmem:[#allocation7 + $0x18] sm:$0xff]  ;;  %v361_v8 = vpack.c.bf16 %v346_v5, %v345_v3  ;;  %v347_v9 = vld [vmem:[#allocation5 + $0x10] sm:$0xff]  ;;  %v423_v13 = vld [vmem:[#allocation7 + $0x20] sm:$0xff]  ;;  %s1790_s12 = smov 32   ;;  %vm824_vm2 = vcmask 130048   ;;  %vm1119_vm3 = vcmask 523264  }
  0x88   : > { %v348_v10 = vld [vmem:[#allocation5 + $0x18] sm:$0xff]  ;;  %1340 = vmatpush3.bf16.msra.mxu1 %v435_v4  ;;  %v436_v11 = vpack.c.bf16 %v422_v7, %v421_v6  ;;  %v424_v14 = vld [vmem:[#allocation7 + $0x28] sm:$0xff]  ;;  %v349_v15 = vld [vmem:[#allocation5 + $0x20] sm:$0xff]  ;;  %s340_s16 = scalar_lea.vmem [#allocation10], %s1253_s23  ;;  %vm1122_vm4 = vcmask 785408   ;;  %s1275_s11 = sshll.u32 %s1855_s28, 8 }
  0x89   : > { %1320 = vmatpush3.bf16.msra.mxu0 %v361_v8  ;;  %1341 = vmatprep.subr.bf16.mxu1 %v1786_v0  ;;  %v362_v12 = vpack.c.bf16 %v348_v10, %v347_v9  ;;  %v350_v16 = vld [vmem:[#allocation5 + $0x28] sm:$0xff]  ;;  %v437_v17 = vpack.c.bf16 %v424_v14, %v423_v13  ;;  %v425_v19 = vld [vmem:[#allocation7 + $0x30] sm:$0xff]  ;;  %v426_v20 = vld [vmem:[#allocation7 + $0x38] sm:$0xff]  ;;  %s1141_s29 = sshll.u32 %s340_s16, 4  ;;  %s2186_s23 = scalar_lea.hbm %s2237_s7, %s1275_s11  ;;  %s2180_s29 = int_to_ptr.vmem [resolvable:$true] %s1141_s29 }
  0x8a   : > { %1321 = vmatprep.subr.bf16.mxu0 %v1786_v0  ;;  %v363_v18 = vpack.c.bf16 %v350_v16, %v349_v15  ;;  %v351_v21 = vld [vmem:[#allocation5 + $0x30] sm:$0xff]  ;;  %v352_v22 = vld [vmem:[#allocation5 + $0x38] sm:$0xff]  ;;  %v438_v23 = vpack.c.bf16 %v426_v20, %v425_v19  ;;  %v427_v25 = vld [vmem:[#allocation7 + $0x40] sm:$0xff]  ;;  %s1128_s28 = scalar_lea.sflag [#allocation4], %s2039_s17  ;;  %s1704_s9 = scalar_lea.vmem %s2180_s29, 256 }
  0x8b   : > { %v364_v24 = vpack.c.bf16 %v352_v22, %v351_v21  ;;  %v428_v26 = vld [vmem:[#allocation7 + $0x48] sm:$0xff]  ;;  %v353_v27 = vld [vmem:[#allocation5 + $0x40] sm:$0xff]  ;;  %v429_v31 = vld [vmem:[#allocation7 + $0x50] sm:$0xff]  ;;  %p1705_p10 = scmp.ne.s32.totalorder %s2180_s29, %s1704_s9  ;;  %s1791_s13 = smov [#allocation10]  }
  0x8c   : > { %1342 = vmatpush3.bf16.msra.mxu1 %v436_v11  ;;  %v354_v28 = vld [vmem:[#allocation5 + $0x48] sm:$0xff]  ;;  %v439_v29 = vpack.c.bf16 %v428_v26, %v427_v25  ;;  %v430_v32 = vld [vmem:[#allocation7 + $0x58] sm:$0xff]  ;;  %v355_v33 = vld [vmem:[#allocation5 + $0x50] sm:$0xff]  ;;  %s1708_s15 = sshll.u32 %s1791_s13, 4  ;;  %s1709_s15 = int_to_ptr.vmem [resolvable:$false] %s1708_s15 }
  0x8d   : > { %1322 = vmatpush3.bf16.msra.mxu0 %v362_v12  ;;  %1343 = vmatprep.subr.bf16.mxu1 %v1786_v0  ;;  %v365_v30 = vpack.c.bf16 %v354_v28, %v353_v27  ;;  %v356_v34 = vld [vmem:[#allocation5 + $0x58] sm:$0xff]  ;;  %v440_v35 = vpack.c.bf16 %v430_v32, %v429_v31  ;;  %v431_v37 = vld [vmem:[#allocation7 + $0x60] sm:$0xff]  ;;  %v432_v38 = vld [vmem:[#allocation7 + $0x68] sm:$0xff]  ;;  %p1706_p3 = pnand %p1705_p10, %p1988_p5  ;;  %p1711_p12 = scmp.lt.s32.totalorder %s2180_s29, %s1709_s15 }
  0x8e   : > { %1323 = vmatprep.subr.bf16.mxu0 %v1786_v0  ;;  %v366_v36 = vpack.c.bf16 %v356_v34, %v355_v33  ;;  %v357_v39 = vld [vmem:[#allocation5 + $0x60] sm:$0xff]  ;;  %v358_v40 = vld [vmem:[#allocation5 + $0x68] sm:$0xff]  ;;  %v441_v41 = vpack.c.bf16 %v432_v38, %v431_v37  ;;  %v433_v43 = vld [vmem:[#allocation7 + $0x70] sm:$0xff] }
  0x8f   : > { %v367_v42 = vpack.c.bf16 %v358_v40, %v357_v39  ;;  %v434_v44 = vld [vmem:[#allocation7 + $0x78] sm:$0xff]  ;;  %v359_v45 = vld [vmem:[#allocation5 + $0x70] sm:$0xff]  ;;  %v1258_v52 = vld [vmem:[%s2232_s2] ss:$0 sm:$0xff]  ;;  %p1707_p7 = pneg %p1706_p3 }
  0x90   : > { %1344 = vmatpush3.bf16.msra.mxu1 %v437_v17  ;;  %v360_v46 = vld [vmem:[#allocation5 + $0x78] sm:$0xff]  ;;  %v442_v47 = vpack.c.bf16 %v434_v44, %v433_v43  ;;  %v342_v48 = vld [vmem:[%s2045_s8] sm:$0xff]  ;;  %v492_v58 = vld [vmem:[#allocation8 + $0x8] sm:$0xff] }
  0x91   : > { %1324 = vmatpush3.bf16.msra.mxu0 %v363_v18  ;;  %1345 = vmatprep.subr.bf16.mxu1 %v1786_v0  ;;  %v343_v49 = vld [vmem:[%s2045_s8 + $0x8] sm:$0xff]  ;;  %v368_v50 = vpack.c.bf16 %v360_v46, %v359_v45  ;;  %v1259_v53 = vld [vmem:[%s2234_s4] ss:$0 sm:$0xff]  ;;  %v493_v9 = vld [vmem:[#allocation8 + $0x10] sm:$0xff] }
  0x92   : > { %1325 = vmatprep.subr.bf16.mxu0 %v1786_v0  ;;  %v2081_v51 = vpack.c.bf16 %v343_v49, %v342_v48  ;;  %v491_v57 = vld [vmem:[#allocation8] sm:$0xff]  ;;  %v494_v10 = vld [vmem:[#allocation8 + $0x18] sm:$0xff]  ;;  %v496_v17 = vld [vmem:[#allocation8 + $0x28] sm:$0xff] }
  0x93   : > { %v507_v62 = vpack.c.bf16 %v492_v58, %v491_v57  ;;  %v508_v12 = vpack.c.bf16 %v494_v10, %v493_v9  ;;  %v495_v16 = vld [vmem:[#allocation8 + $0x20] sm:$0xff]  ;;  %v497_v19 = vld [vmem:[#allocation8 + $0x30] sm:$0xff]  ;;  %v498_v20 = vld [vmem:[#allocation8 + $0x38] sm:$0xff] }
  0x94   : > { %1346 = vmatpush3.bf16.msra.mxu1 %v438_v23  ;;  %v509_v18 = vpack.c.bf16 %v496_v17, %v495_v16  ;;  %v510_v21 = vpack.c.bf16 %v498_v20, %v497_v19  ;;  %v499_v22 = vld [vmem:[#allocation8 + $0x40] sm:$0xff]  ;;  %v500_v23 = vld [vmem:[#allocation8 + $0x48] sm:$0xff]  ;;  %v501_v25 = vld [vmem:[#allocation8 + $0x50] sm:$0xff] }
  0x95   : > { %1326 = vmatpush3.bf16.msra.mxu0 %v364_v24  ;;  %1347 = vmatprep.subr.bf16.mxu1 %v1786_v0  ;;  %v511_v24 = vpack.c.bf16 %v500_v23, %v499_v22  ;;  %v502_v26 = vld [vmem:[#allocation8 + $0x58] sm:$0xff]  ;;  %v503_v28 = vld [vmem:[#allocation8 + $0x60] sm:$0xff]  ;;  %v505_v31 = vld [vmem:[#allocation8 + $0x70] sm:$0xff] }
  0x96   : > { %1327 = vmatprep.subr.bf16.mxu0 %v1786_v0  ;;  %v512_v27 = vpack.c.bf16 %v502_v26, %v501_v25  ;;  %v506_v32 = vld [vmem:[#allocation8 + $0x78] sm:$0xff] }
  0x97   : > { %v514_v33 = vpack.c.bf16 %v506_v32, %v505_v31 }
  0x98   : > { %1348 = vmatpush3.bf16.msra.mxu1 %v439_v29  ;;  %v504_v29 = vld [vmem:[#allocation8 + $0x68] sm:$0xff] }
  0x99   : > { %1328 = vmatpush3.bf16.msra.mxu0 %v365_v30  ;;  %1349 = vmatprep.subr.bf16.mxu1 %v1786_v0  ;;  %v513_v30 = vpack.c.bf16 %v504_v29, %v503_v28 }
  0x9a   : > { %1329 = vmatprep.subr.bf16.mxu0 %v1786_v0 }
  0x9c   : > { %1350 = vmatpush3.bf16.msra.mxu1 %v440_v35 }
  0x9d   : > { %1330 = vmatpush3.bf16.msra.mxu0 %v366_v36  ;;  %1351 = vmatprep.subr.bf16.mxu1 %v1786_v0 }
  0x9e   : > { %1331 = vmatprep.subr.bf16.mxu0 %v1786_v0 }
  0xa0   : > { %1352 = vmatpush3.bf16.msra.mxu1 %v441_v41 }
  0xa1   : > { %1332 = vmatpush3.bf16.msra.mxu0 %v367_v42  ;;  %1353 = vmatprep.subr.bf16.mxu1 %v1786_v0 }
  0xa2   : > { %1333 = vmatprep.subr.bf16.mxu0 %v1786_v0 }
  0xa4   : > { %1354 = vmatpush3.bf16.msra.mxu1 %v442_v47 }
  0xa5   : > { %1334 = vmatpush3.bf16.msra.mxu0 %v368_v50  ;;  %1379 = vmatprep.subr.bf16.mxu1 %v1786_v0 }
  0xa6   : > { %1359 = vmatprep.subr.bf16.mxu0 %v1786_v0 }
  0xa7   : > { %1356 = vmatmul.mubr.bf16.vlgmr.msra.gmra.mrb[0].mxu1 %v2081_v51 }
  0xa8   : > { %1336 = vmatmul.mubr.bf16.vlgmr.msra.gmra.mrb[0].mxu0 %v2081_v51  ;;  %1381 = vmatprep.mubr.msk.bf16.mxu1 %vm1787_vm0, %v1786_v0 }
  0xa9   : > { %1375 = vmatprep.mubr.msk.bf16.mxu0 %vm1787_vm0, %v1786_v0  ;;  %1360 = vmatpush3.bf16.msra.mxu0 %v507_v62 }
  0xaa   : > { %1361 = vmatprep.subr.bf16.mxu0 %v1786_v0 }
  0xad   : > { %1362 = vmatpush3.bf16.msra.mxu0 %v508_v12 }
  0xae   : > { %1363 = vmatprep.subr.bf16.mxu0 %v1786_v0 }
  0xb1   : > { %1364 = vmatpush3.bf16.msra.mxu0 %v509_v18 }
  0xb2   : > { %1365 = vmatprep.subr.bf16.mxu0 %v1786_v0 }
  0xb5   : > { %1366 = vmatpush3.bf16.msra.mxu0 %v510_v21 }
  0xb6   : > { %1367 = vmatprep.subr.bf16.mxu0 %v1786_v0 }
  0xb9   : > { %1368 = vmatpush3.bf16.msra.mxu0 %v511_v24 }
  0xba   : > { %1369 = vmatprep.subr.bf16.mxu0 %v1786_v0 }
  0xbd   : > { %1370 = vmatpush3.bf16.msra.mxu0 %v512_v27 }
  0xbe   : > { %1371 = vmatprep.subr.bf16.mxu0 %v1786_v0 }
  0xc1   : > { %1372 = vmatpush3.bf16.msra.mxu0 %v513_v30 }
  0xc2   : > { %1373 = vmatprep.subr.bf16.mxu0 %v1786_v0 }
  0xc5   : > { %1374 = vmatpush3.bf16.msra.mxu0 %v514_v33 }
  0xc6   : > { %1403 = vmatprep.subr.bf16.mxu0 %v1786_v0 }
  0xc8   : > { %1376 = vmatmul.mubr.bf16.vlgmr.msra.gmra.mrb[4].mxu0 %v2081_v51 }
  0xc9   : > { %1405 = vmatprep.mubr.msk.bf16.mxu0 %vm1787_vm0, %v1786_v0 }
 0x17a   : > { %v484_v54 = vpop.f32.mrb[0].mxu1 }
 0x17b   : > { %v1357_v55 = vpop.f32.mrb[1].mxu1  ;;  %v410_v56 = vpop.f32.mrb[0].mxu0  ;;  %v485_v63 = vadd.f32 %v1259_v53, %v484_v54 }
 0x17c   : > { %v411_v59 = vadd.f32 %v1258_v52, %v410_v56  ;;  %v487_v60 = vpop.f32.mrb[2].mxu1  ;;  %v1337_v61 = vpop.f32.mrb[1].mxu0 }
 0x17d   : > { %v488_v1 = vadd.f32 %v1259_v53, %v487_v60  ;;  %v1358_v2 = vpop.f32.mrb[3].mxu1  ;;  %v413_v3 = vpop.f32.mrb[2].mxu0 }
 0x17e   : > { %v417_v4 = vmul.f32 0.17677669, %v411_v59  ;;  %v414_v5 = vadd.f32 %v1258_v52, %v413_v3  ;;  %v1338_v6 = vpop.f32.mrb[3].mxu0 }
 0x17f   : > { %v1523_v7 = vpack.i.bf16 %v488_v1, %v485_v63  ;;  %v607_v8 = vpack.c.bf16 %v488_v1, %v485_v63 }
 0x180   : > { %v418_v11 = vmul.f32 0.17677669, %v414_v5 }
 0x181   : > { %1524 = vrot.lane.b32.xlu1 %v1523_v7, %s1788_s10  ;;  %1514 = vrot.lane.b32.xlu0 %v1523_v7, %s1789_s14  ;;  %v640_v13 = vsel %vm635_vm1, %v607_v8, 0  ;;  %v1260_v8 = vld [vmem:[%s2236_s6] ss:$0 sm:$0xff] }
 0x182   : > { %v583_v14 = vpack.c.bf16 %v418_v11, %v417_v4  ;;  %1380 = vmatpush3.bf16.xpose.msra.mxu1 %v640_v13  ;;  %v1528_v15 = vpack.i.bf16 %v418_v11, %v417_v4 }
 0x183   : > { %1385 = vmatprep.subr.bf16.mxu1 %v1786_v0 }
 0x185   : > { %1529 = vrot.lane.b32.xlu1 %v1528_v15, %s1788_s10  ;;  %1519 = vrot.lane.b32.xlu0 %v1528_v15, %s1789_s14 }
 0x189   : > { %1539 = vrot.lane.b32.xlu1 %v1528_v15, %s1790_s12  ;;  %1534 = vrot.lane.b32.xlu0 %v1523_v7, %s1790_s12 }
 0x18a   : > { %1382 = vmatmul.mubr.msk.bf16.vlgmr.msra.gmra.mrb[4].mxu1 %vm635_vm1, %v583_v14 }
 0x18b   : > { %1387 = vmatprep.mubr.msk.bf16.mxu1 %vm1787_vm0, %v1786_v0 }
 0x19b   : > { %v556_v4 = vpop.f32.mrb[4].mxu0 }
 0x19c   : > { %v1377_v5 = vpop.f32.mrb[5].mxu0  ;;  %v557_v9 = vadd.f32 %v1260_v8, %v556_v4 }
 0x19d   : > { %v559_v6 = vpop.f32.mrb[6].mxu0 }
 0x19e   : > { %v1378_v7 = vpop.f32.mrb[7].mxu0  ;;  %v560_v10 = vadd.f32 %v1260_v8, %v559_v6 }
 0x1a0   : > { %v631_v11 = vpack.c.bf16 %v560_v10, %v557_v9  ;;  %v1543_v33 = vpack.i.bf16 %v560_v10, %v557_v9 }
 0x1a2   : > { %1404 = vmatpush3.bf16.msra.mxu0 %v631_v11 }
 0x1a3   : > { %1415 = vmatprep.subr.bf16.mxu0 %v1786_v0 }
 0x1f3   : > { %v1515_v34 = vpop.permute.xlu0 %1514  ;;  %v1525_v37 = vpop.permute.xlu1 %1524 }
 0x1f4   : > { %v1517_v35 = vunpack.i.h.bf16 %v1515_v34  ;;  %v1516_v36 = vunpack.i.l.bf16 %v1515_v34  ;;  %v1527_v40 = vunpack.i.h.bf16 %v1525_v37  ;;  %v1526_v41 = vunpack.i.l.bf16 %v1525_v37 }
 0x1f6   : > { %v608_v38 = vpack.c.bf16 %v1517_v35, %v1516_v36  ;;  %v609_v45 = vpack.c.bf16 %v1527_v40, %v1526_v41 }
 0x1f7   : > { %v1520_v39 = vpop.permute.xlu0 %1519  ;;  %v1530_v51 = vpop.permute.xlu1 %1529 }
 0x1f8   : > { %v687_v42 = vsel %vm635_vm1, %v608_v38, 0  ;;  %v1522_v43 = vunpack.i.h.bf16 %v1520_v39  ;;  %v1521_v44 = vunpack.i.l.bf16 %v1520_v39  ;;  %v734_v50 = vsel %vm635_vm1, %v609_v45, 0 }
 0x1f9   : > { %1386 = vmatpush3.bf16.xpose.msra.mxu1 %v687_v42  ;;  %v1532_v52 = vunpack.i.h.bf16 %v1530_v51  ;;  %v1531_v53 = vunpack.i.l.bf16 %v1530_v51 }
 0x1fa   : > { %1391 = vmatprep.subr.bf16.mxu1 %v1786_v0  ;;  %v584_v47 = vpack.c.bf16 %v1522_v43, %v1521_v44 }
 0x1fb   : > { %v1535_v46 = vpop.permute.xlu0 %1534  ;;  %v585_v55 = vpack.c.bf16 %v1532_v52, %v1531_v53  ;;  %v1540_v56 = vpop.permute.xlu1 %1539 }
 0x1fc   : > { %v1537_v48 = vunpack.i.h.bf16 %v1535_v46  ;;  %v1536_v49 = vunpack.i.l.bf16 %v1535_v46  ;;  %v1542_v58 = vunpack.i.h.bf16 %v1540_v56  ;;  %v1541_v59 = vunpack.i.l.bf16 %v1540_v56 }
 0x1fe   : > { %v610_v54 = vpack.c.bf16 %v1537_v48, %v1536_v49  ;;  %v586_v60 = vpack.c.bf16 %v1542_v58, %v1541_v59 }
 0x200   : > { %1388 = vmatmul.mubr.msk.bf16.vlgmr.msra.gmra.mrb[8].mxu1 %vm635_vm1, %v584_v47  ;;  %v781_v57 = vsel %vm635_vm1, %v610_v54, 0 }
 0x201   : > { %1392 = vmatpush3.bf16.xpose.msra.mxu1 %v734_v50  ;;  %1393 = vmatprep.mubr.msk.bf16.mxu1 %vm1787_vm0, %v1786_v0 }
 0x202   : > { %1397 = vmatprep.subr.bf16.mxu1 %v1786_v0 }
 0x208   : > { %1394 = vmatmul.mubr.msk.bf16.vlgmr.msra.gmra.mrb[12].mxu1 %vm635_vm1, %v585_v55 }
 0x209   : > { %1398 = vmatpush3.bf16.xpose.msra.mxu1 %v781_v57  ;;  %1399 = vmatprep.mubr.msk.bf16.mxu1 %vm1787_vm0, %v1786_v0 }
 0x20a   : > { %1409 = vmatprep.subr.bf16.mxu1 %v1786_v0 }
 0x210   : > { %1400 = vmatmul.mubr.msk.bf16.vlgmr.msra.gmra.mrb[16].mxu1 %vm635_vm1, %v586_v60 }
 0x211   : > { %1411 = vmatprep.mubr.msk.bf16.mxu1 %vm1787_vm0, %v1786_v0 }
 0x25d   : > { %v676_v61 = vpop.f32.mrb[4].mxu1 }
 0x25e   : > { %v1383_v62 = vpop.f32.mrb[5].mxu1  ;;  %v825_v63 = vsel %vm824_vm2, %v676_v61, -inf }
 0x25f   : > { %826 = vmax.xlane.f32.xlu0 %v825_v63  ;;  %v679_v1 = vpop.f32.mrb[6].mxu1 }
 0x260   : > { %v1384_v2 = vpop.f32.mrb[7].mxu1  ;;  %v828_v3 = vsel %vm824_vm2, %v679_v1, -inf }
 0x261   : > { %829 = vmax.xlane.f32.xlu1 %v828_v3 }
 0x2d3   : > { %v723_v12 = vpop.f32.mrb[8].mxu1 }
 0x2d4   : > { %v1389_v13 = vpop.f32.mrb[9].mxu1  ;;  %v831_v14 = vsel %vm824_vm2, %v723_v12, -inf }
 0x2d5   : > { %832 = vmax.xlane.f32.xlu0 %v831_v14  ;;  %v726_v15 = vpop.f32.mrb[10].mxu1 }
 0x2d6   : > { %v1390_v16 = vpop.f32.mrb[11].mxu1  ;;  %v834_v17 = vsel %vm824_vm2, %v726_v15, -inf }
 0x2d9   : > { %835 = vmax.xlane.f32.xlu0 %v834_v17 }
 0x2db   : > { %v770_v18 = vpop.f32.mrb[12].mxu1 }
 0x2dc   : > { %v1395_v19 = vpop.f32.mrb[13].mxu1  ;;  %v837_v20 = vsel %vm824_vm2, %v770_v18, -inf }
 0x2dd   : > { %838 = vmax.xlane.f32.xlu1 %v837_v20  ;;  %v773_v21 = vpop.f32.mrb[14].mxu1 }
 0x2de   : > { %v1396_v22 = vpop.f32.mrb[15].mxu1  ;;  %v840_v23 = vsel %vm824_vm2, %v773_v21, -inf }
 0x2df   : > { %841 = vmax.xlane.f32.xlu0 %v840_v23 }
 0x2e3   : > { %v817_v24 = vpop.f32.mrb[16].mxu1 }
 0x2e4   : > { %v1401_v25 = vpop.f32.mrb[17].mxu1  ;;  %v843_v26 = vsel %vm824_vm2, %v817_v24, -inf }
 0x2e5   : > { %844 = vmax.xlane.f32.xlu1 %v843_v26  ;;  %v820_v27 = vpop.f32.mrb[18].mxu1 }
 0x2e6   : > { %v1402_v28 = vpop.f32.mrb[19].mxu1  ;;  %v846_v29 = vsel %vm824_vm2, %v820_v27, -inf }
 0x2e7   : > { %847 = vmax.xlane.f32.xlu0 %v846_v29 }
 0x2ec   : > { %v827_v36 = vpop.xlane.xlu0 %826 }
 0x2ed   : > { %v849_v37 = vsub.f32 %v676_v61, %v827_v36 }
 0x2ee   : > { %v830_v30 = vpop.xlane.xlu1 %829 }
 0x2ef   : > { %v850_v31 = vsub.f32 %v679_v1, %v830_v30  ;;  %v857_v38 = vmul.f32 1.442695, %v849_v37 }
 0x2f1   : > { %v859_v32 = vmul.f32 1.442695, %v850_v31 }
 0x2f3   : > { %1558 = vpow2.f32 %v859_v32 }
 0x2f4   : > { %1560 = vpow2.f32 %v857_v38 }
 0x2f6   : > { %1544 = vrot.lane.b32.xlu1 %v1543_v33, %s1789_s14 }
 0x2fd   : > { %v2147_v34 = vpop.eup %1558 }
 0x2fe   : > { %v876_v35 = vsel %vm824_vm2, %v2147_v34, 0.0  ;;  %v1561_v39 = vpop.eup %1560 }
 0x2ff   : > { %877 = vadd.xlane.f32.xlu0 %v876_v35  ;;  %v873_v40 = vsel %vm824_vm2, %v1561_v39, 0.0 }
 0x31a   : > { %874 = vadd.xlane.f32.xlu1 %v873_v40 }
 0x362   : > { %v833_v41 = vpop.xlane.xlu0 %832 }
 0x363   : > { %v851_v42 = vsub.f32 %v723_v12, %v833_v41 }
 0x365   : > { %v861_v43 = vmul.f32 1.442695, %v851_v42 }
 0x366   : > { %v836_v44 = vpop.xlane.xlu0 %835 }
 0x367   : > { %1562 = vpow2.f32 %v861_v43  ;;  %v852_v45 = vsub.f32 %v726_v15, %v836_v44 }
 0x369   : > { %v863_v46 = vmul.f32 1.442695, %v852_v45 }
 0x36a   : > { %v839_v47 = vpop.xlane.xlu1 %838 }
 0x36b   : > { %1564 = vpow2.f32 %v863_v46  ;;  %v853_v48 = vsub.f32 %v770_v18, %v839_v47 }
 0x36c   : > { %v842_v49 = vpop.xlane.xlu0 %841 }
 0x36d   : > { %v865_v50 = vmul.f32 1.442695, %v853_v48  ;;  %v854_v51 = vsub.f32 %v773_v21, %v842_v49 }
 0x36f   : > { %1566 = vpow2.f32 %v865_v50  ;;  %v867_v52 = vmul.f32 1.442695, %v854_v51 }
 0x371   : > { %v1563_v53 = vpop.eup %1562  ;;  %1568 = vpow2.f32 %v867_v52 }
 0x372   : > { %v845_v54 = vpop.xlane.xlu1 %844  ;;  %v879_v55 = vsel %vm824_vm2, %v1563_v53, 0.0 }
 0x373   : > { %v855_v56 = vsub.f32 %v817_v24, %v845_v54  ;;  %880 = vadd.xlane.f32.xlu1 %v879_v55 }
 0x374   : > { %v848_v57 = vpop.xlane.xlu0 %847 }
 0x375   : > { %v1565_v58 = vpop.eup %1564  ;;  %v869_v59 = vmul.f32 1.442695, %v855_v56  ;;  %v856_v60 = vsub.f32 %v820_v27, %v848_v57 }
 0x376   : > { %v882_v61 = vsel %vm824_vm2, %v1565_v58, 0.0  ;;  %v1545_v62 = vpop.permute.xlu1 %1544 }
 0x377   : > { %1570 = vpow2.f32 %v869_v59  ;;  %v871_v63 = vmul.f32 1.442695, %v856_v60  ;;  %883 = vadd.xlane.f32.xlu0 %v882_v61  ;;  %v1547_v1 = vunpack.i.h.bf16 %v1545_v62  ;;  %v1546_v2 = vunpack.i.l.bf16 %v1545_v62 }
 0x379   : > { %v1567_v3 = vpop.eup %1566  ;;  %1572 = vpow2.f32 %v871_v63  ;;  %v632_v4 = vpack.c.bf16 %v1547_v1, %v1546_v2 }
 0x37a   : > { %v885_v5 = vsel %vm824_vm2, %v1567_v3, 0.0 }
 0x37b   : > { %v1569_v6 = vpop.eup %1568  ;;  %886 = vadd.xlane.f32.xlu1 %v885_v5  ;;  %1410 = vmatpush3.bf16.msra.mxu1 %v632_v4 }
 0x37c   : > { %v888_v7 = vsel %vm824_vm2, %v1569_v6, 0.0  ;;  %1421 = vmatprep.subr.bf16.mxu1 %v1786_v0 }
 0x37d   : > { %889 = vadd.xlane.f32.xlu0 %v888_v7 }
 0x381   : > { %v1571_v8 = vpop.eup %1570 }
 0x382   : > { %v891_v9 = vsel %vm824_vm2, %v1571_v8, 0.0 }
 0x383   : > { %v1573_v10 = vpop.eup %1572  ;;  %892 = vadd.xlane.f32.xlu1 %v891_v9 }
 0x384   : > { %v894_v11 = vsel %vm824_vm2, %v1573_v10, 0.0 }
 0x385   : > { %895 = vadd.xlane.f32.xlu0 %v894_v11 }
 0x38c   : > { %v878_v12 = vpop.xlane.xlu0 %877 }
 0x38d   : > { %1574 = vrcp.f32 %v878_v12 }
 0x394   : > { %1554 = vrot.lane.b32.xlu1 %v1543_v33, %s1790_s12 }
 0x397   : > { %v1575_v14 = vpop.eup %1574 }
 0x398   : > { %v906_v16 = vmul.f32 %v1575_v14, %v2147_v34 }
 0x39b   : > { %1549 = vrot.lane.b32.xlu0 %v1543_v33, %s1788_s10 }
 0x3a7   : > { %v875_v13 = vpop.xlane.xlu1 %874 }
 0x3a8   : > { %1576 = vrcp.f32 %v875_v13 }
 0x3b2   : > { %v1577_v15 = vpop.eup %1576 }
 0x3b3   : > { %v905_v17 = vmul.f32 %v1577_v15, %v1561_v39 }
 0x3b5   : > { %v913_v18 = vpack.c.bf16 %v906_v16, %v905_v17 }
 0x3b7   : > { %1406 = vmatmul.mubr.msk.bf16.vlgmr.msra.gmra.mrb[8].mxu0 %vm824_vm2, %v913_v18 }
 0x3b8   : > { %1417 = vmatprep.mubr.msk.bf16.mxu0 %vm1787_vm0, %v1786_v0 }
 0x400   : > { %v881_v19 = vpop.xlane.xlu1 %880 }
 0x401   : > { %1578 = vrcp.f32 %v881_v19 }
 0x404   : > { %v884_v20 = vpop.xlane.xlu0 %883 }
 0x405   : > { %1580 = vrcp.f32 %v884_v20 }
 0x408   : > { %v887_v21 = vpop.xlane.xlu1 %886 }
 0x40a   : > { %v890_v22 = vpop.xlane.xlu0 %889 }
 0x40b   : > { %1582 = vrcp.f32 %v890_v22  ;;  %v1579_v23 = vpop.eup %1578 }
 0x40c   : > { %1584 = vrcp.f32 %v887_v21  ;;  %v907_v25 = vmul.f32 %v1579_v23, %v1563_v53 }
 0x40f   : > { %v1581_v24 = vpop.eup %1580 }
 0x410   : > { %v908_v26 = vmul.f32 %v1581_v24, %v1565_v58  ;;  %v893_v27 = vpop.xlane.xlu1 %892 }
 0x411   : > { %1586 = vrcp.f32 %v893_v27 }
 0x412   : > { %v896_v28 = vpop.xlane.xlu0 %895  ;;  %v914_v29 = vpack.c.bf16 %v908_v26, %v907_v25 }
 0x413   : > { %1588 = vrcp.f32 %v896_v28 }
 0x414   : > { %v1555_v30 = vpop.permute.xlu1 %1554  ;;  %1412 = vmatmul.mubr.msk.bf16.vlgmr.msra.gmra.mrb[20].mxu1 %vm824_vm2, %v914_v29 }
 0x415   : > { %v1583_v31 = vpop.eup %1582  ;;  %v1557_v32 = vunpack.i.h.bf16 %v1555_v30  ;;  %v1556_v33 = vunpack.i.l.bf16 %v1555_v30  ;;  %1423 = vmatprep.mubr.msk.bf16.mxu1 %vm1787_vm0, %v1786_v0 }
 0x416   : > { %v1550_v34 = vpop.permute.xlu0 %1549  ;;  %v1585_v35 = vpop.eup %1584  ;;  %v910_v39 = vmul.f32 %v1583_v31, %v1569_v6 }
 0x417   : > { %v634_v36 = vpack.c.bf16 %v1557_v32, %v1556_v33  ;;  %v1552_v37 = vunpack.i.h.bf16 %v1550_v34  ;;  %v1551_v38 = vunpack.i.l.bf16 %v1550_v34  ;;  %v909_v41 = vmul.f32 %v1585_v35, %v1567_v3 }
 0x419   : > { %v633_v40 = vpack.c.bf16 %v1552_v37, %v1551_v38  ;;  %1422 = vmatpush3.bf16.msra.mxu1 %v634_v36  ;;  %v915_v43 = vpack.c.bf16 %v910_v39, %v909_v41 }
 0x41b   : > { %v1587_v42 = vpop.eup %1586  ;;  %1416 = vmatpush3.bf16.msra.mxu0 %v633_v40 }
 0x41c   : > { %v911_v45 = vmul.f32 %v1587_v42, %v1571_v8 }
 0x41d   : > { %v1589_v44 = vpop.eup %1588 }
 0x41e   : > { %v912_v46 = vmul.f32 %v1589_v44, %v1573_v10  ;;  %1418 = vmatmul.mubr.msk.bf16.vlgmr.msra.gmra.mrb[12].mxu0 %vm824_vm2, %v915_v43 }
 0x420   : > { %v916_v47 = vpack.c.bf16 %v912_v46, %v911_v45 }
 0x422   : > { %1424 = vmatmul.mubr.msk.bf16.vlgmr.msra.gmra.mrb[24].mxu1 %vm824_vm2, %v916_v47 }
 0x48a   : > { %v954_v0 = vpop.f32.mrb[8].mxu0 }
 0x48b   : > { %v1407_v48 = vpop.f32.mrb[9].mxu0 }
 0x48c   : > { %v957_v49 = vpop.f32.mrb[10].mxu0 }
 0x48d   : > { %v1408_v50 = vpop.f32.mrb[11].mxu0 }
 0x4e7   : > { %v998_v51 = vpop.f32.mrb[20].mxu1 }
 0x4e8   : > { %1095 = vrot.lane.b32.xlu1 %v998_v51, %s1790_s12  ;;  %v1413_v52 = vpop.f32.mrb[21].mxu1 }
 0x4e9   : > { %v1001_v53 = vpop.f32.mrb[22].mxu1 }
 0x4ea   : > { %1097 = vrot.lane.b32.xlu0 %v1001_v53, %s1790_s12  ;;  %v1414_v54 = vpop.f32.mrb[23].mxu1 }
 0x4f1   : > { %v1042_v55 = vpop.f32.mrb[12].mxu0 }
 0x4f2   : > { %1103 = vrot.lane.b32.xlu1 %v1042_v55, %s1788_s10  ;;  %v1419_v56 = vpop.f32.mrb[13].mxu0 }
 0x4f3   : > { %v1045_v57 = vpop.f32.mrb[14].mxu0 }
 0x4f4   : > { %1105 = vrot.lane.b32.xlu0 %v1045_v57, %s1788_s10  ;;  %v1420_v58 = vpop.f32.mrb[15].mxu0  ;;  %s1710_s10 = scalar_lea.vmem %s1709_s15, 512 }
 0x4f5   : > { %v1086_v59 = vpop.f32.mrb[24].mxu1  ;;  %p1712_p1 = scmp.lt.s32.totalorder %s1710_s10, %s1704_s9 }
 0x4f6   : > { %v1425_v60 = vpop.f32.mrb[25].mxu1  ;;  %1111 = vrot.lane.b32.xlu1 %v1086_v59, %s1789_s14 }
 0x4f7   : > { %v1089_v61 = vpop.f32.mrb[26].mxu1  ;;  %p1713_p2 = por %p1712_p1, %p1711_p12 }
 0x4f8   : > { %v1426_v62 = vpop.f32.mrb[27].mxu1  ;;  %1113 = vrot.lane.b32.xlu0 %v1089_v61, %s1789_s14 }
 0x4f9   : > { %p1714_p4 = pnand %p1713_p2, %p1707_p7 }
 0x55a   : > { %v1096_v63 = vpop.permute.xlu1 %1095 }
 0x55b   : > { %v1117_v4 = vsel %vm635_vm1, %v954_v0, %v1096_v63 }
 0x55c   : > { %v1098_v1 = vpop.permute.xlu0 %1097 }
 0x55d   : > { %v1118_v7 = vsel %vm635_vm1, %v957_v49, %v1098_v1 }
 0x564   : > { %v1104_v2 = vpop.permute.xlu1 %1103 }
 0x565   : > { %v1120_v5 = vsel %vm1119_vm3, %v1117_v4, %v1104_v2 }
 0x566   : > { %v1106_v3 = vpop.permute.xlu0 %1105 }
 0x567   : > { %v1121_v9 = vsel %vm1119_vm3, %v1118_v7, %v1106_v3 }
 0x568   : > { %v1112_v6 = vpop.permute.xlu1 %1111 }
 0x569   : > { %v1123_v8 = vsel %vm1122_vm4, %v1120_v5, %v1112_v6 }
 0x56a   : > { %1125 = vst [vmem:[%s340_s16] sm:$0xff] %v1123_v8  ;;  %v1114_v10 = vpop.permute.xlu0 %1113 }
 0x56b   : > { %v1124_v11 = vsel %vm1122_vm4, %v1121_v9, %v1114_v10 }
 0x56c   : > { %1126 = vst [vmem:[%s340_s16 + $0x8] sm:$0xff] %v1124_v11 }
 0x56d   : > { %1717 = shalt.err (!%p1714_p4)
}
 0x56e   : > { %s1718_s14 = scalar_lea.hbm %s2186_s23, 256  ;;  %s1722_s21 = scalar_lea.hbm %s2237_s7, 512 }
 0x56f   : > { %p1719_p9 = scmp.ne.s32.totalorder %s2186_s23, %s1718_s14  ;;  %p1723_p8 = scmp.lt.u32.totalorder %s2186_s23, %s2237_s7 }
 0x570   : > { %p1724_p13 = scmp.lt.u32.totalorder %s1722_s21, %s1718_s14  ;;  %p1726_p10 = scmp.lt.u32.totalorder %s1718_s14, %s2186_s23 }
 0x571   : > { %p1720_p0 = pnand %p1719_p9, %p1988_p5 }
 0x572   : > { %p1725_p6 = por %p1724_p13, %p1723_p8 }
 0x573   : > { %p1721_p11 = pneg %p1720_p0 }
 0x574   : > { %p1727_p3 = por %p1726_p10, %p1725_p6 }
 0x576   : > { %p1728_p7 = pnand %p1727_p3, %p1721_p11 }
 0x578   : > { %1731 = shalt.err (!%p1728_p7)
}
 0x579   : > { %s1792_s8 = smov 128   ;;  %s1793_s30 = smov 8  }
 0x57a   : > { %1441 = dma.vmem_to_hbm [thread:$0]  (%p1988_p5), %s2180_s29, 256, %s2186_s23, %s1128_s28, %s1792_s8, %s1792_s8, %s1793_s30  }
 0x57b PF: > { %s2257_s9 = sld [smem:[#allocation15_spill]]  ;;  %s1156_s13 = sand.u32 1, %s1766_s24  }
 0x57c   : > { %p2259_p1 = scmp.ge.s32.totalorder %s1778_s27, 2  ;;  %s1157_s15 = scalar_lea.sflag [#allocation4], %s1156_s13 }
 0x581   : > { %p2258_p12 = scmp.ne.s32.totalorder %s2257_s9, 0 }
 0x583   : > { %p1458_p2 = pnand %p2259_p1, %p2258_p12 }
 0x585   : > { %1761 = dma.done.wait (!%p1458_p2), %s1157_s15, 256  }
 0x586   : > { %1763 = vsyncadd (!%p1458_p2), %s1157_s15, 4294967040  ;;  %p22_p4 = scmp.ge.s32.totalorder %s1974_s22, 4   ;;  %s2260_s24 = smov %s1770_s25 }
 0x587   : > { %s2261_s25 = smov %s1774_s26  ;;  %s2262_s26 = smov %s1984_s18 }
 0x588   : > { %s2263_s27 = smov %s1974_s22  ;;  %24 = sbr.rel (!%p22_p4) target bundleno = 7 (0x7), region = 105 }
 0x58f   :  { %1162 = vsyncpa [#allocation3], 1 }
 0x590   :  { %1164 = vsyncpa [#allocation3 + $0x1], 1 }
 0x591   :  { %1165 = vsyncpa [#allocation6], 1 }
 0x592   :  { %1166 = vsyncpa [#allocation9], 1 }
 0x593   :  { %1167 = vsyncpa [#allocation4], 1 }
 0x594   :  { %1169 = vsyncpa [#allocation4 + $0x1], 1 }

// kernel: tpu_custom_call.1
= control target key start
LH: loop header
LB: loop body
LE: loop exit
PB: predicated region body
PF: predicated region fallthrough
CT: control target
= control target key end

     0   :  { %12 = vsyncpa [#allocation3], 0  ;;  %s2230_s0 = inlined_call_operand.hbm [shape: f32[2,16,128], index: 0, kind: input, shape index: {}]   ;;  %s2231_s1 = inlined_call_operand.hbm [shape: f32[128,128], index: 1, kind: input, shape index: {}]   ;;  %s2232_s2 = inlined_call_operand.vmem [shape: f32[1,128], index: 2, kind: input, shape index: {}]   ;;  %s2233_s3 = inlined_call_operand.hbm [shape: f32[128,128], index: 3, kind: input, shape index: {}]   ;;  %s2234_s4 = inlined_call_operand.vmem [shape: f32[1,128], index: 4, kind: input, shape index: {}]   ;;  %s2235_s5 = inlined_call_operand.hbm [shape: f32[128,128], index: 5, kind: input, shape index: {}]   ;;  %s2236_s6 = inlined_call_operand.vmem [shape: f32[1,128], index: 6, kind: input, shape index: {}]   ;;  %s2237_s7 = inlined_call_operand.hbm [shape: f32[2,16,128], index: 7, kind: output, shape index: {}]  }
   0x1   :  { %14 = vsyncpa [#allocation3 + $0x1], 0 }
   0x2   :  { %15 = vsyncpa [#allocation6], 0 }
   0x3   :  { %16 = vsyncpa [#allocation9], 0 }
   0x4   :  { %17 = vsyncpa [#allocation4], 0 }
   0x5   :  { %19 = vsyncpa [#allocation4 + $0x1], 0  ;;  %s1834_s24 = smov 0   ;;  %s1836_s25 = smov 0  }
   0x6   :  { %s1838_s26 = smov 0   ;;  %s1840_s27 = smov 0  }
   0x7 LB: > { %s1855_s28 = sadd.s32 4294967295, %s1778_s27   ;;  %s1243_s29 = sadd.s32 4294967294, %s1778_s27   ;;  %s1778_s27 = sphi %s1840_s27, %s2263_s27   ;;  %s1774_s26 = sphi %s1838_s26, %s2262_s26   ;;  %s1770_s25 = sphi %s1836_s25, %s2261_s25   ;;  %s1766_s24 = sphi %s1834_s24, %s2260_s24  }
   0x8   : > { %p45_p0 = scmp.ne.s32.totalorder %s1770_s25, %s1766_s24  ;;  %p2238_p1 = scmp.eq.s32.totalorder %s1855_s28, 0 }
   0x9   : > { %p201_p3 = scmp.eq.s32.totalorder %s1243_s29, 1  ;;  %p1244_p5 = scmp.ge.s32.totalorder %s1778_s27, 1 }
   0xa   : > { %p1864_p4 = por %p2238_p1, %p45_p0  ;;  %p208_p7 = scmp.lt.s32.totalorder %s1778_s27, 3 }
   0xb   : > { %p1869_p6 = por %p201_p3, %p45_p0  ;;  %s1780_s10 = smov [#allocation5]  }
   0xc   : > { %s2242_s30 = scalar_select %p1864_p4, 1, 0 }
   0xd   : > { %s2243_s8 = scalar_select %p1869_p6, 1, 0 }
   0xe   : > { %p1874_p8 = pnand %p1244_p5, %p208_p7  ;;  %s220_s11 = sshll.u32 %s1780_s10, 4  ;;  %s1878_s11 = int_to_ptr.vmem [resolvable:$true] %s220_s11 }
   0xf   : > { %2244 = sst [smem:[#allocation15_spill]] %s2243_s8  ;;  %s1781_s13 = smov [#allocation7]  }
  0x10   : > { %s2245_s9 = scalar_select %p1874_p8, 1, 0 }
  0x11   : > { %p1443_p9 = pneg %p1874_p8  ;;  %s236_s14 = sshll.u32 %s1781_s13, 4  ;;  %s1889_s14 = int_to_ptr.vmem [resolvable:$true] %s236_s14 }
  0x12   : > { %s1782_s15 = smov [#allocation8]   ;;  %s1590_s19 = scalar_lea.hbm %s2231_s1, 2048 }
  0x13   : > { %p1885_p11 = pnand %p1443_p9, %p2238_p1  ;;  %s1891_s16 = sshll.u32 %s1782_s15, 4  ;;  %s253_s16 = int_to_ptr.vmem [resolvable:$true] %s1891_s16 }
  0x14   : > { %p1591_p12 = scmp.ne.s32.totalorder %s2231_s1, %s1590_s19  ;;  %p1597_p5 = scmp.lt.u32.totalorder %s1590_s19, %s2231_s1 }
  0x15   : > { %p1901_p13 = pneg %p1885_p11 }
  0x17   : > { %p1593_p0 = pnand %p1901_p13, %p1591_p12 }
  0x19   : > { %p1594_p3 = pneg %p1593_p0 }
  0x1b   : > { %p1599_p7 = pnand %p1597_p5, %p1594_p3 }
  0x1d   : > { %1602 = shalt.err (!%p1599_p7)
}
  0x1e   : > { %s1603_s10 = scalar_lea.vmem %s1878_s11, 2048  ;;  %p1611_p2 = scmp.lt.s32.totalorder %s1878_s11, %s1878_s11 }
  0x1f   : > { %p1604_p9 = scmp.ne.s32.totalorder %s1878_s11, %s1603_s10  ;;  %p1612_p6 = scmp.lt.s32.totalorder %s1603_s10, %s1603_s10 }
  0x21   : > { %p1606_p10 = pnand %p1604_p9, %p1901_p13  ;;  %p1613_p12 = por %p1612_p6, %p1611_p2 }
  0x23   : > { %p1607_p1 = pneg %p1606_p10 }
  0x25   : > { %p1614_p0 = pnand %p1613_p12, %p1607_p1 }
  0x27   : > { %1617 = shalt.err (!%p1614_p0)
}
  0x28   : > { %s1783_s13 = smov 128   ;;  %s1784_s15 = smov 8  }
  0x29   : > { %1446 = dma.hbm_to_vmem [thread:$0]  (!%p1885_p11), %s2231_s1, 2048, %s1878_s11, [#allocation6], %s1783_s13, %s1783_s13, %s1784_s15  }
  0x2a   : > { %s1618_s21 = scalar_lea.hbm %s2233_s3, 2048 }
  0x2b   : > { %p1619_p1 = scmp.ne.s32.totalorder %s2233_s3, %s1618_s21  ;;  %p1625_p10 = scmp.lt.u32.totalorder %s1618_s21, %s2233_s3 }
  0x2d   : > { %p1621_p2 = pnand %p1619_p1, %p1901_p13 }
  0x2f   : > { %p1622_p6 = pneg %p1621_p2 }
  0x31   : > { %p1627_p3 = pnand %p1625_p10, %p1622_p6 }
  0x33   : > { %1630 = shalt.err (!%p1627_p3)
}
  0x34   : > { %s1631_s11 = scalar_lea.vmem %s1889_s14, 2048  ;;  %p1639_p12 = scmp.lt.s32.totalorder %s1889_s14, %s1889_s14 }
  0x35   : > { %p1632_p5 = scmp.ne.s32.totalorder %s1889_s14, %s1631_s11  ;;  %p1640_p0 = scmp.lt.s32.totalorder %s1631_s11, %s1631_s11 }
  0x37   : > { %p1634_p7 = pnand %p1632_p5, %p1901_p13  ;;  %p1641_p1 = por %p1640_p0, %p1639_p12 }
  0x39   : > { %p1635_p9 = pneg %p1634_p7 }
  0x3b   : > { %p1642_p2 = pnand %p1641_p1, %p1635_p9 }
  0x3d   : > { %1645 = shalt.err (!%p1642_p2)
}
  0x3e   : > { %1449 = dma.hbm_to_vmem [thread:$0]  (!%p1885_p11), %s2233_s3, 2048, %s1889_s14, [#allocation6], %s1783_s13, %s1783_s13, %s1784_s15  }
  0x3f   : > { %s1646_s20 = scalar_lea.hbm %s2235_s5, 2048 }
  0x40   : > { %p1647_p6 = scmp.ne.s32.totalorder %s2235_s5, %s1646_s20  ;;  %p1653_p5 = scmp.lt.u32.totalorder %s1646_s20, %s2235_s5 }
  0x42   : > { %p1649_p10 = pnand %p1647_p6, %p1901_p13 }
  0x44   : > { %p1650_p3 = pneg %p1649_p10 }
  0x46   : > { %p1655_p7 = pnand %p1653_p5, %p1650_p3 }
  0x48   : > { %1658 = shalt.err (!%p1655_p7)
}
  0x49   : > { %s1659_s11 = scalar_lea.vmem %s253_s16, 2048  ;;  %p1667_p1 = scmp.lt.s32.totalorder %s253_s16, %s253_s16 }
  0x4a   : > { %p1660_p9 = scmp.ne.s32.totalorder %s253_s16, %s1659_s11  ;;  %p1668_p2 = scmp.lt.s32.totalorder %s1659_s11, %s1659_s11 }
  0x4c   : > { %p1662_p12 = pnand %p1660_p9, %p1901_p13  ;;  %p1669_p4 = por %p1668_p2, %p1667_p1 }
  0x4e   : > { %p1663_p0 = pneg %p1662_p12 }
  0x50   : > { %p1670_p8 = pnand %p1669_p4, %p1663_p0 }
  0x52   : > { %1673 = shalt.err (!%p1670_p8)
}
  0x53   : > { %1452 = dma.hbm_to_vmem [thread:$0]  (!%p1885_p11), %s2235_s5, 2048, %s253_s16, [#allocation9], %s1783_s13, %s1783_s13, %s1784_s15  }
  0x54   : > { %s1974_s22 = sadd.s32 1, %s1778_s27   ;;  %s32_s17 = sadd.s32 1, %s1774_s26 }
  0x55   : > { %s29_s12 = ssub.s32 %s1778_s27, %s1974_s22  ;;  %p39_p8 = scmp.ne.s32.totalorder %s1774_s26, %s1770_s25 }
  0x56   : > { %p30_p4 = scmp.eq.s32.totalorder %s29_s12, 0  ;;  %p40_p13 = scmp.eq.s32.totalorder %s1778_s27, 0 }
  0x57   : > { %p1464_p6 = scmp.lt.s32.totalorder %s1778_s27, 2  ;;  %p2248_p3 = scmp.eq.s32.totalorder %s1855_s28, 1 }
  0x58   : > { %s1984_s18 = scalar_select %p30_p4, %s1774_s26, %s32_s17  }
  0x59   : > { %p41_p10 = por %p40_p13, %p39_p8  ;;  %p1988_p5 = por %p2248_p3, %p39_p8 }
  0x5a   : > { %s269_s20 = sand.u32 1, %s1774_s26   ;;  %s1274_s21 = sshll.u32 %s1778_s27, 8 }
  0x5b   : > { %s1249_s16 = sshll.u32 %s269_s20, 4  ;;  %s1997_s10 = scalar_lea.hbm %s2230_s0, %s1274_s21 }
  0x5c   : > { %s273_s11 = scalar_lea.vmem [#allocation2], %s1249_s16  ;;  %p1999_p11 = pnand %p1464_p6, %p41_p10 }
  0x5d   : > { %s280_s14 = sshll.u32 %s273_s11, 4  ;;  %s2005_s12 = scalar_lea.sflag [#allocation3], %s269_s20  ;;  %s2003_s14 = int_to_ptr.vmem [resolvable:$true] %s280_s14 }
  0x5e   : > { %s1674_s17 = scalar_lea.hbm %s1997_s10, 256  ;;  %p1676_p9 = pneg %p1999_p11 }
  0x5f   : > { %p1675_p7 = scmp.ne.s32.totalorder %s1997_s10, %s1674_s17  ;;  %s1679_s23 = scalar_lea.hbm %s2230_s0, 512 }
  0x60   : > { %p1680_p1 = scmp.lt.u32.totalorder %s1997_s10, %s2230_s0  ;;  %p1681_p2 = scmp.lt.u32.totalorder %s1679_s23, %s1674_s17 }
  0x61   : > { %p1677_p12 = pnand %p1676_p9, %p1675_p7  ;;  %p1683_p8 = scmp.lt.u32.totalorder %s1674_s17, %s1997_s10 }
  0x62   : > { %p1682_p4 = por %p1681_p2, %p1680_p1 }
  0x63   : > { %p1678_p0 = pneg %p1677_p12 }
  0x64   : > { %p1684_p13 = por %p1683_p8, %p1682_p4 }
  0x66   : > { %p1685_p6 = pnand %p1684_p13, %p1678_p0 }
  0x68   : > { %1688 = shalt.err (!%p1685_p6)
}
  0x69   : > { %s1689_s20 = scalar_lea.vmem %s2003_s14, 256  ;;  %s1785_s21 = smov [#allocation2]  }
  0x6a   : > { %p1690_p10 = scmp.ne.s32.totalorder %s2003_s14, %s1689_s20  ;;  %s1694_s16 = sshll.u32 %s1785_s21, 4  ;;  %s1695_s16 = int_to_ptr.vmem [resolvable:$false] %s1694_s16 }
  0x6b   : > { %s1696_s29 = scalar_lea.vmem %s1695_s16, 512  ;;  %p1697_p12 = scmp.lt.s32.totalorder %s2003_s14, %s1695_s16 }
  0x6c   : > { %p1692_p3 = pnand %p1690_p10, %p1676_p9  ;;  %p1698_p1 = scmp.lt.s32.totalorder %s1696_s29, %s1689_s20 }
  0x6e   : > { %p1693_p7 = pneg %p1692_p3  ;;  %p1699_p2 = por %p1698_p1, %p1697_p12 }
  0x70   : > { %p1700_p4 = pnand %p1699_p2, %p1693_p7 }
  0x72   : > { %1703 = shalt.err (!%p1700_p4)
}
  0x73   : > { %1456 = dma.hbm_to_vmem [thread:$0]  (!%p1999_p11), %s1997_s10, 256, %s2003_s14, %s2005_s12, %s1783_s13, %s1783_s13, %s1784_s15  }
  0x74   : > { %p2251_p9 = scmp.ne.s32.totalorder %s2245_s9, 0 }
  0x75   : > { %s2039_s17 = sand.u32 (!%p2251_p9), 1, %s1770_s25   ;;  %p2252_p0 = scmp.ne.s32.totalorder (!%p2251_p9), %s2242_s30, 0 }
  0x76   : > { %292 = sbr.rel (%p2251_p9) target bundleno = 1403 (0x57b), region = 48  ;;  %s1253_s23 = sshll.u32 (!%p2251_p9), %s2039_s17, 4 }
  0x77   : > { %s295_s11 = scalar_lea.sflag (!%p2251_p9), [#allocation3], %s2039_s17  ;;  %s2045_s8 = scalar_lea.vmem (!%p2251_p9), [#allocation2], %s1253_s23 }
  0x7d   : > { %1749 = dma.done.wait (%p2252_p0), %s295_s11, 256  }
  0x7e   : > { %1751 = vsyncadd (%p2252_p0), %s295_s11, 4294967040  ;;  %p2253_p11 = scmp.eq.s32.totalorder %s1855_s28, 0 }
  0x80   : > { %1753 = dma.done.wait (%p2253_p11), [#allocation6], 4096   ;;  %p2254_p8 = pmov %p2253_p11 }
  0x82   : > { %1755 = vsyncadd (%p2254_p8), [#allocation6], 4294963200  ;;  %p2255_p13 = pmov %p2254_p8 }
  0x83   : > { %p2256_p6 = pmov %p2254_p8 }
  0x84   : > { %1757 = dma.done.wait (%p2255_p13), [#allocation9], 2048  }
  0x85   : > { %1759 = vsyncadd (%p2256_p6), [#allocation9], 4294965248  ;;  %v1786_v0 = vmov 0.0   ;;  %vm1787_vm0 = vmmov 0   ;;  %v419_v1 = vld [vmem:[#allocation7] sm:$0xff]  ;;  %v420_v2 = vld [vmem:[#allocation7 + $0x8] sm:$0xff] }
  0x86   : > { %1339 = vmatprep.subr.bf16.mxu1 %v1786_v0  ;;  %1319 = vmatprep.subr.bf16.mxu0 %v1786_v0  ;;  %v345_v3 = vld [vmem:[#allocation5] sm:$0xff]  ;;  %v435_v4 = vpack.c.bf16 %v420_v2, %v419_v1  ;;  %v346_v5 = vld [vmem:[#allocation5 + $0x8] sm:$0xff]  ;;  %v421_v6 = vld [vmem:[#allocation7 + $0x10] sm:$0xff]  ;;  %vm635_vm1 = vcmask 261120   ;;  %s1788_s10 = smov 64   ;;  %s1789_s14 = smov 96  }
  0x87   : > { %1355 = vmatprep.mubr.msk.bf16.mxu1 %vm1787_vm0, %v1786_v0  ;;  %1335 = vmatprep.mubr.msk.bf16.mxu0 %vm1787_vm0, %v1786_v0  ;;  %v422_v7 = vld [vmem:[#allocation7 + $0x18] sm:$0xff]  ;;  %v361_v8 = vpack.c.bf16 %v346_v5, %v345_v3  ;;  %v347_v9 = vld [vmem:[#allocation5 + $0x10] sm:$0xff]  ;;  %v423_v13 = vld [vmem:[#allocation7 + $0x20] sm:$0xff]  ;;  %s1790_s12 = smov 32   ;;  %vm824_vm2 = vcmask 130048   ;;  %vm1119_vm3 = vcmask 523264  }
  0x88   : > { %v348_v10 = vld [vmem:[#allocation5 + $0x18] sm:$0xff]  ;;  %1340 = vmatpush3.bf16.msra.mxu1 %v435_v4  ;;  %v436_v11 = vpack.c.bf16 %v422_v7, %v421_v6  ;;  %v424_v14 = vld [vmem:[#allocation7 + $0x28] sm:$0xff]  ;;  %v349_v15 = vld [vmem:[#allocation5 + $0x20] sm:$0xff]  ;;  %s340_s16 = scalar_lea.vmem [#allocation10], %s1253_s23  ;;  %vm1122_vm4 = vcmask 785408   ;;  %s1275_s11 = sshll.u32 %s1855_s28, 8 }
  0x89   : > { %1320 = vmatpush3.bf16.msra.mxu0 %v361_v8  ;;  %1341 = vmatprep.subr.bf16.mxu1 %v1786_v0  ;;  %v362_v12 = vpack.c.bf16 %v348_v10, %v347_v9  ;;  %v350_v16 = vld [vmem:[#allocation5 + $0x28] sm:$0xff]  ;;  %v437_v17 = vpack.c.bf16 %v424_v14, %v423_v13  ;;  %v425_v19 = vld [vmem:[#allocation7 + $0x30] sm:$0xff]  ;;  %v426_v20 = vld [vmem:[#allocation7 + $0x38] sm:$0xff]  ;;  %s1141_s29 = sshll.u32 %s340_s16, 4  ;;  %s2186_s23 = scalar_lea.hbm %s2237_s7, %s1275_s11  ;;  %s2180_s29 = int_to_ptr.vmem [resolvable:$true] %s1141_s29 }
  0x8a   : > { %1321 = vmatprep.subr.bf16.mxu0 %v1786_v0  ;;  %v363_v18 = vpack.c.bf16 %v350_v16, %v349_v15  ;;  %v351_v21 = vld [vmem:[#allocation5 + $0x30] sm:$0xff]  ;;  %v352_v22 = vld [vmem:[#allocation5 + $0x38] sm:$0xff]  ;;  %v438_v23 = vpack.c.bf16 %v426_v20, %v425_v19  ;;  %v427_v25 = vld [vmem:[#allocation7 + $0x40] sm:$0xff]  ;;  %s1128_s28 = scalar_lea.sflag [#allocation4], %s2039_s17  ;;  %s1704_s9 = scalar_lea.vmem %s2180_s29, 256 }
  0x8b   : > { %v364_v24 = vpack.c.bf16 %v352_v22, %v351_v21  ;;  %v428_v26 = vld [vmem:[#allocation7 + $0x48] sm:$0xff]  ;;  %v353_v27 = vld [vmem:[#allocation5 + $0x40] sm:$0xff]  ;;  %v429_v31 = vld [vmem:[#allocation7 + $0x50] sm:$0xff]  ;;  %p1705_p10 = scmp.ne.s32.totalorder %s2180_s29, %s1704_s9  ;;  %s1791_s13 = smov [#allocation10]  }
  0x8c   : > { %1342 = vmatpush3.bf16.msra.mxu1 %v436_v11  ;;  %v354_v28 = vld [vmem:[#allocation5 + $0x48] sm:$0xff]  ;;  %v439_v29 = vpack.c.bf16 %v428_v26, %v427_v25  ;;  %v430_v32 = vld [vmem:[#allocation7 + $0x58] sm:$0xff]  ;;  %v355_v33 = vld [vmem:[#allocation5 + $0x50] sm:$0xff]  ;;  %s1708_s15 = sshll.u32 %s1791_s13, 4  ;;  %s1709_s15 = int_to_ptr.vmem [resolvable:$false] %s1708_s15 }
  0x8d   : > { %1322 = vmatpush3.bf16.msra.mxu0 %v362_v12  ;;  %1343 = vmatprep.subr.bf16.mxu1 %v1786_v0  ;;  %v365_v30 = vpack.c.bf16 %v354_v28, %v353_v27  ;;  %v356_v34 = vld [vmem:[#allocation5 + $0x58] sm:$0xff]  ;;  %v440_v35 = vpack.c.bf16 %v430_v32, %v429_v31  ;;  %v431_v37 = vld [vmem:[#allocation7 + $0x60] sm:$0xff]  ;;  %v432_v38 = vld [vmem:[#allocation7 + $0x68] sm:$0xff]  ;;  %p1706_p3 = pnand %p1705_p10, %p1988_p5  ;;  %p1711_p12 = scmp.lt.s32.totalorder %s2180_s29, %s1709_s15 }
  0x8e   : > { %1323 = vmatprep.subr.bf16.mxu0 %v1786_v0  ;;  %v366_v36 = vpack.c.bf16 %v356_v34, %v355_v33  ;;  %v357_v39 = vld [vmem:[#allocation5 + $0x60] sm:$0xff]  ;;  %v358_v40 = vld [vmem:[#allocation5 + $0x68] sm:$0xff]  ;;  %v441_v41 = vpack.c.bf16 %v432_v38, %v431_v37  ;;  %v433_v43 = vld [vmem:[#allocation7 + $0x70] sm:$0xff] }
  0x8f   : > { %v367_v42 = vpack.c.bf16 %v358_v40, %v357_v39  ;;  %v434_v44 = vld [vmem:[#allocation7 + $0x78] sm:$0xff]  ;;  %v359_v45 = vld [vmem:[#allocation5 + $0x70] sm:$0xff]  ;;  %v1258_v52 = vld [vmem:[%s2232_s2] ss:$0 sm:$0xff]  ;;  %p1707_p7 = pneg %p1706_p3 }
  0x90   : > { %1344 = vmatpush3.bf16.msra.mxu1 %v437_v17  ;;  %v360_v46 = vld [vmem:[#allocation5 + $0x78] sm:$0xff]  ;;  %v442_v47 = vpack.c.bf16 %v434_v44, %v433_v43  ;;  %v342_v48 = vld [vmem:[%s2045_s8] sm:$0xff]  ;;  %v492_v58 = vld [vmem:[#allocation8 + $0x8] sm:$0xff] }
  0x91   : > { %1324 = vmatpush3.bf16.msra.mxu0 %v363_v18  ;;  %1345 = vmatprep.subr.bf16.mxu1 %v1786_v0  ;;  %v343_v49 = vld [vmem:[%s2045_s8 + $0x8] sm:$0xff]  ;;  %v368_v50 = vpack.c.bf16 %v360_v46, %v359_v45  ;;  %v1259_v53 = vld [vmem:[%s2234_s4] ss:$0 sm:$0xff]  ;;  %v493_v9 = vld [vmem:[#allocation8 + $0x10] sm:$0xff] }
  0x92   : > { %1325 = vmatprep.subr.bf16.mxu0 %v1786_v0  ;;  %v2081_v51 = vpack.c.bf16 %v343_v49, %v342_v48  ;;  %v491_v57 = vld [vmem:[#allocation8] sm:$0xff]  ;;  %v494_v10 = vld [vmem:[#allocation8 + $0x18] sm:$0xff]  ;;  %v496_v17 = vld [vmem:[#allocation8 + $0x28] sm:$0xff] }
  0x93   : > { %v507_v62 = vpack.c.bf16 %v492_v58, %v491_v57  ;;  %v508_v12 = vpack.c.bf16 %v494_v10, %v493_v9  ;;  %v495_v16 = vld [vmem:[#allocation8 + $0x20] sm:$0xff]  ;;  %v497_v19 = vld [vmem:[#allocation8 + $0x30] sm:$0xff]  ;;  %v498_v20 = vld [vmem:[#allocation8 + $0x38] sm:$0xff] }
  0x94   : > { %1346 = vmatpush3.bf16.msra.mxu1 %v438_v23  ;;  %v509_v18 = vpack.c.bf16 %v496_v17, %v495_v16  ;;  %v510_v21 = vpack.c.bf16 %v498_v20, %v497_v19  ;;  %v499_v22 = vld [vmem:[#allocation8 + $0x40] sm:$0xff]  ;;  %v500_v23 = vld [vmem:[#allocation8 + $0x48] sm:$0xff]  ;;  %v501_v25 = vld [vmem:[#allocation8 + $0x50] sm:$0xff] }
  0x95   : > { %1326 = vmatpush3.bf16.msra.mxu0 %v364_v24  ;;  %1347 = vmatprep.subr.bf16.mxu1 %v1786_v0  ;;  %v511_v24 = vpack.c.bf16 %v500_v23, %v499_v22  ;;  %v502_v26 = vld [vmem:[#allocation8 + $0x58] sm:$0xff]  ;;  %v503_v28 = vld [vmem:[#allocation8 + $0x60] sm:$0xff]  ;;  %v505_v31 = vld [vmem:[#allocation8 + $0x70] sm:$0xff] }
  0x96   : > { %1327 = vmatprep.subr.bf16.mxu0 %v1786_v0  ;;  %v512_v27 = vpack.c.bf16 %v502_v26, %v501_v25  ;;  %v506_v32 = vld [vmem:[#allocation8 + $0x78] sm:$0xff] }
  0x97   : > { %v514_v33 = vpack.c.bf16 %v506_v32, %v505_v31 }
  0x98   : > { %1348 = vmatpush3.bf16.msra.mxu1 %v439_v29  ;;  %v504_v29 = vld [vmem:[#allocation8 + $0x68] sm:$0xff] }
  0x99   : > { %1328 = vmatpush3.bf16.msra.mxu0 %v365_v30  ;;  %1349 = vmatprep.subr.bf16.mxu1 %v1786_v0  ;;  %v513_v30 = vpack.c.bf16 %v504_v29, %v503_v28 }
  0x9a   : > { %1329 = vmatprep.subr.bf16.mxu0 %v1786_v0 }
  0x9c   : > { %1350 = vmatpush3.bf16.msra.mxu1 %v440_v35 }
  0x9d   : > { %1330 = vmatpush3.bf16.msra.mxu0 %v366_v36  ;;  %1351 = vmatprep.subr.bf16.mxu1 %v1786_v0 }
  0x9e   : > { %1331 = vmatprep.subr.bf16.mxu0 %v1786_v0 }
  0xa0   : > { %1352 = vmatpush3.bf16.msra.mxu1 %v441_v41 }
  0xa1   : > { %1332 = vmatpush3.bf16.msra.mxu0 %v367_v42  ;;  %1353 = vmatprep.subr.bf16.mxu1 %v1786_v0 }
  0xa2   : > { %1333 = vmatprep.subr.bf16.mxu0 %v1786_v0 }
  0xa4   : > { %1354 = vmatpush3.bf16.msra.mxu1 %v442_v47 }
  0xa5   : > { %1334 = vmatpush3.bf16.msra.mxu0 %v368_v50  ;;  %1379 = vmatprep.subr.bf16.mxu1 %v1786_v0 }
  0xa6   : > { %1359 = vmatprep.subr.bf16.mxu0 %v1786_v0 }
  0xa7   : > { %1356 = vmatmul.mubr.bf16.vlgmr.msra.gmra.mrb[0].mxu1 %v2081_v51 }
  0xa8   : > { %1336 = vmatmul.mubr.bf16.vlgmr.msra.gmra.mrb[0].mxu0 %v2081_v51  ;;  %1381 = vmatprep.mubr.msk.bf16.mxu1 %vm1787_vm0, %v1786_v0 }
  0xa9   : > { %1375 = vmatprep.mubr.msk.bf16.mxu0 %vm1787_vm0, %v1786_v0  ;;  %1360 = vmatpush3.bf16.msra.mxu0 %v507_v62 }
  0xaa   : > { %1361 = vmatprep.subr.bf16.mxu0 %v1786_v0 }
  0xad   : > { %1362 = vmatpush3.bf16.msra.mxu0 %v508_v12 }
  0xae   : > { %1363 = vmatprep.subr.bf16.mxu0 %v1786_v0 }
  0xb1   : > { %1364 = vmatpush3.bf16.msra.mxu0 %v509_v18 }
  0xb2   : > { %1365 = vmatprep.subr.bf16.mxu0 %v1786_v0 }
  0xb5   : > { %1366 = vmatpush3.bf16.msra.mxu0 %v510_v21 }
  0xb6   : > { %1367 = vmatprep.subr.bf16.mxu0 %v1786_v0 }
  0xb9   : > { %1368 = vmatpush3.bf16.msra.mxu0 %v511_v24 }
  0xba   : > { %1369 = vmatprep.subr.bf16.mxu0 %v1786_v0 }
  0xbd   : > { %1370 = vmatpush3.bf16.msra.mxu0 %v512_v27 }
  0xbe   : > { %1371 = vmatprep.subr.bf16.mxu0 %v1786_v0 }
  0xc1   : > { %1372 = vmatpush3.bf16.msra.mxu0 %v513_v30 }
  0xc2   : > { %1373 = vmatprep.subr.bf16.mxu0 %v1786_v0 }
  0xc5   : > { %1374 = vmatpush3.bf16.msra.mxu0 %v514_v33 }
  0xc6   : > { %1403 = vmatprep.subr.bf16.mxu0 %v1786_v0 }
  0xc8   : > { %1376 = vmatmul.mubr.bf16.vlgmr.msra.gmra.mrb[4].mxu0 %v2081_v51 }
  0xc9   : > { %1405 = vmatprep.mubr.msk.bf16.mxu0 %vm1787_vm0, %v1786_v0 }
 0x17a   : > { %v484_v54 = vpop.f32.mrb[0].mxu1 }
 0x17b   : > { %v1357_v55 = vpop.f32.mrb[1].mxu1  ;;  %v410_v56 = vpop.f32.mrb[0].mxu0  ;;  %v485_v63 = vadd.f32 %v1259_v53, %v484_v54 }
 0x17c   : > { %v411_v59 = vadd.f32 %v1258_v52, %v410_v56  ;;  %v487_v60 = vpop.f32.mrb[2].mxu1  ;;  %v1337_v61 = vpop.f32.mrb[1].mxu0 }
 0x17d   : > { %v488_v1 = vadd.f32 %v1259_v53, %v487_v60  ;;  %v1358_v2 = vpop.f32.mrb[3].mxu1  ;;  %v413_v3 = vpop.f32.mrb[2].mxu0 }
 0x17e   : > { %v417_v4 = vmul.f32 0.17677669, %v411_v59  ;;  %v414_v5 = vadd.f32 %v1258_v52, %v413_v3  ;;  %v1338_v6 = vpop.f32.mrb[3].mxu0 }
 0x17f   : > { %v1523_v7 = vpack.i.bf16 %v488_v1, %v485_v63  ;;  %v607_v8 = vpack.c.bf16 %v488_v1, %v485_v63 }
 0x180   : > { %v418_v11 = vmul.f32 0.17677669, %v414_v5 }
 0x181   : > { %1524 = vrot.lane.b32.xlu1 %v1523_v7, %s1788_s10  ;;  %1514 = vrot.lane.b32.xlu0 %v1523_v7, %s1789_s14  ;;  %v640_v13 = vsel %vm635_vm1, %v607_v8, 0  ;;  %v1260_v8 = vld [vmem:[%s2236_s6] ss:$0 sm:$0xff] }
 0x182   : > { %v583_v14 = vpack.c.bf16 %v418_v11, %v417_v4  ;;  %1380 = vmatpush3.bf16.xpose.msra.mxu1 %v640_v13  ;;  %v1528_v15 = vpack.i.bf16 %v418_v11, %v417_v4 }
 0x183   : > { %1385 = vmatprep.subr.bf16.mxu1 %v1786_v0 }
 0x185   : > { %1529 = vrot.lane.b32.xlu1 %v1528_v15, %s1788_s10  ;;  %1519 = vrot.lane.b32.xlu0 %v1528_v15, %s1789_s14 }
 0x189   : > { %1539 = vrot.lane.b32.xlu1 %v1528_v15, %s1790_s12  ;;  %1534 = vrot.lane.b32.xlu0 %v1523_v7, %s1790_s12 }
 0x18a   : > { %1382 = vmatmul.mubr.msk.bf16.vlgmr.msra.gmra.mrb[4].mxu1 %vm635_vm1, %v583_v14 }
 0x18b   : > { %1387 = vmatprep.mubr.msk.bf16.mxu1 %vm1787_vm0, %v1786_v0 }
 0x19b   : > { %v556_v4 = vpop.f32.mrb[4].mxu0 }
 0x19c   : > { %v1377_v5 = vpop.f32.mrb[5].mxu0  ;;  %v557_v9 = vadd.f32 %v1260_v8, %v556_v4 }
 0x19d   : > { %v559_v6 = vpop.f32.mrb[6].mxu0 }
 0x19e   : > { %v1378_v7 = vpop.f32.mrb[7].mxu0  ;;  %v560_v10 = vadd.f32 %v1260_v8, %v559_v6 }
 0x1a0   : > { %v631_v11 = vpack.c.bf16 %v560_v10, %v557_v9  ;;  %v1543_v33 = vpack.i.bf16 %v560_v10, %v557_v9 }
 0x1a2   : > { %1404 = vmatpush3.bf16.msra.mxu0 %v631_v11 }
 0x1a3   : > { %1415 = vmatprep.subr.bf16.mxu0 %v1786_v0 }
 0x1f3   : > { %v1515_v34 = vpop.permute.xlu0 %1514  ;;  %v1525_v37 = vpop.permute.xlu1 %1524 }
 0x1f4   : > { %v1517_v35 = vunpack.i.h.bf16 %v1515_v34  ;;  %v1516_v36 = vunpack.i.l.bf16 %v1515_v34  ;;  %v1527_v40 = vunpack.i.h.bf16 %v1525_v37  ;;  %v1526_v41 = vunpack.i.l.bf16 %v1525_v37 }
 0x1f6   : > { %v608_v38 = vpack.c.bf16 %v1517_v35, %v1516_v36  ;;  %v609_v45 = vpack.c.bf16 %v1527_v40, %v1526_v41 }
 0x1f7   : > { %v1520_v39 = vpop.permute.xlu0 %1519  ;;  %v1530_v51 = vpop.permute.xlu1 %1529 }
 0x1f8   : > { %v687_v42 = vsel %vm635_vm1, %v608_v38, 0  ;;  %v1522_v43 = vunpack.i.h.bf16 %v1520_v39  ;;  %v1521_v44 = vunpack.i.l.bf16 %v1520_v39  ;;  %v734_v50 = vsel %vm635_vm1, %v609_v45, 0 }
 0x1f9   : > { %1386 = vmatpush3.bf16.xpose.msra.mxu1 %v687_v42  ;;  %v1532_v52 = vunpack.i.h.bf16 %v1530_v51  ;;  %v1531_v53 = vunpack.i.l.bf16 %v1530_v51 }
 0x1fa   : > { %1391 = vmatprep.subr.bf16.mxu1 %v1786_v0  ;;  %v584_v47 = vpack.c.bf16 %v1522_v43, %v1521_v44 }
 0x1fb   : > { %v1535_v46 = vpop.permute.xlu0 %1534  ;;  %v585_v55 = vpack.c.bf16 %v1532_v52, %v1531_v53  ;;  %v1540_v56 = vpop.permute.xlu1 %1539 }
 0x1fc   : > { %v1537_v48 = vunpack.i.h.bf16 %v1535_v46  ;;  %v1536_v49 = vunpack.i.l.bf16 %v1535_v46  ;;  %v1542_v58 = vunpack.i.h.bf16 %v1540_v56  ;;  %v1541_v59 = vunpack.i.l.bf16 %v1540_v56 }
 0x1fe   : > { %v610_v54 = vpack.c.bf16 %v1537_v48, %v1536_v49  ;;  %v586_v60 = vpack.c.bf16 %v1542_v58, %v1541_v59 }
 0x200   : > { %1388 = vmatmul.mubr.msk.bf16.vlgmr.msra.gmra.mrb[8].mxu1 %vm635_vm1, %v584_v47  ;;  %v781_v57 = vsel %vm635_vm1, %v610_v54, 0 }
 0x201   : > { %1392 = vmatpush3.bf16.xpose.msra.mxu1 %v734_v50  ;;  %1393 = vmatprep.mubr.msk.bf16.mxu1 %vm1787_vm0, %v1786_v0 }
 0x202   : > { %1397 = vmatprep.subr.bf16.mxu1 %v1786_v0 }
 0x208   : > { %1394 = vmatmul.mubr.msk.bf16.vlgmr.msra.gmra.mrb[12].mxu1 %vm635_vm1, %v585_v55 }
 0x209   : > { %1398 = vmatpush3.bf16.xpose.msra.mxu1 %v781_v57  ;;  %1399 = vmatprep.mubr.msk.bf16.mxu1 %vm1787_vm0, %v1786_v0 }
 0x20a   : > { %1409 = vmatprep.subr.bf16.mxu1 %v1786_v0 }
 0x210   : > { %1400 = vmatmul.mubr.msk.bf16.vlgmr.msra.gmra.mrb[16].mxu1 %vm635_vm1, %v586_v60 }
 0x211   : > { %1411 = vmatprep.mubr.msk.bf16.mxu1 %vm1787_vm0, %v1786_v0 }
 0x25d   : > { %v676_v61 = vpop.f32.mrb[4].mxu1 }
 0x25e   : > { %v1383_v62 = vpop.f32.mrb[5].mxu1  ;;  %v825_v63 = vsel %vm824_vm2, %v676_v61, -inf }
 0x25f   : > { %826 = vmax.xlane.f32.xlu0 %v825_v63  ;;  %v679_v1 = vpop.f32.mrb[6].mxu1 }
 0x260   : > { %v1384_v2 = vpop.f32.mrb[7].mxu1  ;;  %v828_v3 = vsel %vm824_vm2, %v679_v1, -inf }
 0x261   : > { %829 = vmax.xlane.f32.xlu1 %v828_v3 }
 0x2d3   : > { %v723_v12 = vpop.f32.mrb[8].mxu1 }
 0x2d4   : > { %v1389_v13 = vpop.f32.mrb[9].mxu1  ;;  %v831_v14 = vsel %vm824_vm2, %v723_v12, -inf }
 0x2d5   : > { %832 = vmax.xlane.f32.xlu0 %v831_v14  ;;  %v726_v15 = vpop.f32.mrb[10].mxu1 }
 0x2d6   : > { %v1390_v16 = vpop.f32.mrb[11].mxu1  ;;  %v834_v17 = vsel %vm824_vm2, %v726_v15, -inf }
 0x2d9   : > { %835 = vmax.xlane.f32.xlu0 %v834_v17 }
 0x2db   : > { %v770_v18 = vpop.f32.mrb[12].mxu1 }
 0x2dc   : > { %v1395_v19 = vpop.f32.mrb[13].mxu1  ;;  %v837_v20 = vsel %vm824_vm2, %v770_v18, -inf }
 0x2dd   : > { %838 = vmax.xlane.f32.xlu1 %v837_v20  ;;  %v773_v21 = vpop.f32.mrb[14].mxu1 }
 0x2de   : > { %v1396_v22 = vpop.f32.mrb[15].mxu1  ;;  %v840_v23 = vsel %vm824_vm2, %v773_v21, -inf }
 0x2df   : > { %841 = vmax.xlane.f32.xlu0 %v840_v23 }
 0x2e3   : > { %v817_v24 = vpop.f32.mrb[16].mxu1 }
 0x2e4   : > { %v1401_v25 = vpop.f32.mrb[17].mxu1  ;;  %v843_v26 = vsel %vm824_vm2, %v817_v24, -inf }
 0x2e5   : > { %844 = vmax.xlane.f32.xlu1 %v843_v26  ;;  %v820_v27 = vpop.f32.mrb[18].mxu1 }
 0x2e6   : > { %v1402_v28 = vpop.f32.mrb[19].mxu1  ;;  %v846_v29 = vsel %vm824_vm2, %v820_v27, -inf }
 0x2e7   : > { %847 = vmax.xlane.f32.xlu0 %v846_v29 }
 0x2ec   : > { %v827_v36 = vpop.xlane.xlu0 %826 }
 0x2ed   : > { %v849_v37 = vsub.f32 %v676_v61, %v827_v36 }
 0x2ee   : > { %v830_v30 = vpop.xlane.xlu1 %829 }
 0x2ef   : > { %v850_v31 = vsub.f32 %v679_v1, %v830_v30  ;;  %v857_v38 = vmul.f32 1.442695, %v849_v37 }
 0x2f1   : > { %v859_v32 = vmul.f32 1.442695, %v850_v31 }
 0x2f3   : > { %1558 = vpow2.f32 %v859_v32 }
 0x2f4   : > { %1560 = vpow2.f32 %v857_v38 }
 0x2f6   : > { %1544 = vrot.lane.b32.xlu1 %v1543_v33, %s1789_s14 }
 0x2fd   : > { %v2147_v34 = vpop.eup %1558 }
 0x2fe   : > { %v876_v35 = vsel %vm824_vm2, %v2147_v34, 0.0  ;;  %v1561_v39 = vpop.eup %1560 }
 0x2ff   : > { %877 = vadd.xlane.f32.xlu0 %v876_v35  ;;  %v873_v40 = vsel %vm824_vm2, %v1561_v39, 0.0 }
 0x31a   : > { %874 = vadd.xlane.f32.xlu1 %v873_v40 }
 0x362   : > { %v833_v41 = vpop.xlane.xlu0 %832 }
 0x363   : > { %v851_v42 = vsub.f32 %v723_v12, %v833_v41 }
 0x365   : > { %v861_v43 = vmul.f32 1.442695, %v851_v42 }
 0x366   : > { %v836_v44 = vpop.xlane.xlu0 %835 }
 0x367   : > { %1562 = vpow2.f32 %v861_v43  ;;  %v852_v45 = vsub.f32 %v726_v15, %v836_v44 }
 0x369   : > { %v863_v46 = vmul.f32 1.442695, %v852_v45 }
 0x36a   : > { %v839_v47 = vpop.xlane.xlu1 %838 }
 0x36b   : > { %1564 = vpow2.f32 %v863_v46  ;;  %v853_v48 = vsub.f32 %v770_v18, %v839_v47 }
 0x36c   : > { %v842_v49 = vpop.xlane.xlu0 %841 }
 0x36d   : > { %v865_v50 = vmul.f32 1.442695, %v853_v48  ;;  %v854_v51 = vsub.f32 %v773_v21, %v842_v49 }
 0x36f   : > { %1566 = vpow2.f32 %v865_v50  ;;  %v867_v52 = vmul.f32 1.442695, %v854_v51 }
 0x371   : > { %v1563_v53 = vpop.eup %1562  ;;  %1568 = vpow2.f32 %v867_v52 }
 0x372   : > { %v845_v54 = vpop.xlane.xlu1 %844  ;;  %v879_v55 = vsel %vm824_vm2, %v1563_v53, 0.0 }
 0x373   : > { %v855_v56 = vsub.f32 %v817_v24, %v845_v54  ;;  %880 = vadd.xlane.f32.xlu1 %v879_v55 }
 0x374   : > { %v848_v57 = vpop.xlane.xlu0 %847 }
 0x375   : > { %v1565_v58 = vpop.eup %1564  ;;  %v869_v59 = vmul.f32 1.442695, %v855_v56  ;;  %v856_v60 = vsub.f32 %v820_v27, %v848_v57 }
 0x376   : > { %v882_v61 = vsel %vm824_vm2, %v1565_v58, 0.0  ;;  %v1545_v62 = vpop.permute.xlu1 %1544 }
 0x377   : > { %1570 = vpow2.f32 %v869_v59  ;;  %v871_v63 = vmul.f32 1.442695, %v856_v60  ;;  %883 = vadd.xlane.f32.xlu0 %v882_v61  ;;  %v1547_v1 = vunpack.i.h.bf16 %v1545_v62  ;;  %v1546_v2 = vunpack.i.l.bf16 %v1545_v62 }
 0x379   : > { %v1567_v3 = vpop.eup %1566  ;;  %1572 = vpow2.f32 %v871_v63  ;;  %v632_v4 = vpack.c.bf16 %v1547_v1, %v1546_v2 }
 0x37a   : > { %v885_v5 = vsel %vm824_vm2, %v1567_v3, 0.0 }
 0x37b   : > { %v1569_v6 = vpop.eup %1568  ;;  %886 = vadd.xlane.f32.xlu1 %v885_v5  ;;  %1410 = vmatpush3.bf16.msra.mxu1 %v632_v4 }
 0x37c   : > { %v888_v7 = vsel %vm824_vm2, %v1569_v6, 0.0  ;;  %1421 = vmatprep.subr.bf16.mxu1 %v1786_v0 }
 0x37d   : > { %889 = vadd.xlane.f32.xlu0 %v888_v7 }
 0x381   : > { %v1571_v8 = vpop.eup %1570 }
 0x382   : > { %v891_v9 = vsel %vm824_vm2, %v1571_v8, 0.0 }
 0x383   : > { %v1573_v10 = vpop.eup %1572  ;;  %892 = vadd.xlane.f32.xlu1 %v891_v9 }
 0x384   : > { %v894_v11 = vsel %vm824_vm2, %v1573_v10, 0.0 }
 0x385   : > { %895 = vadd.xlane.f32.xlu0 %v894_v11 }
 0x38c   : > { %v878_v12 = vpop.xlane.xlu0 %877 }
 0x38d   : > { %1574 = vrcp.f32 %v878_v12 }
 0x394   : > { %1554 = vrot.lane.b32.xlu1 %v1543_v33, %s1790_s12 }
 0x397   : > { %v1575_v14 = vpop.eup %1574 }
 0x398   : > { %v906_v16 = vmul.f32 %v1575_v14, %v2147_v34 }
 0x39b   : > { %1549 = vrot.lane.b32.xlu0 %v1543_v33, %s1788_s10 }
 0x3a7   : > { %v875_v13 = vpop.xlane.xlu1 %874 }
 0x3a8   : > { %1576 = vrcp.f32 %v875_v13 }
 0x3b2   : > { %v1577_v15 = vpop.eup %1576 }
 0x3b3   : > { %v905_v17 = vmul.f32 %v1577_v15, %v1561_v39 }
 0x3b5   : > { %v913_v18 = vpack.c.bf16 %v906_v16, %v905_v17 }
 0x3b7   : > { %1406 = vmatmul.mubr.msk.bf16.vlgmr.msra.gmra.mrb[8].mxu0 %vm824_vm2, %v913_v18 }
 0x3b8   : > { %1417 = vmatprep.mubr.msk.bf16.mxu0 %vm1787_vm0, %v1786_v0 }
 0x400   : > { %v881_v19 = vpop.xlane.xlu1 %880 }
 0x401   : > { %1578 = vrcp.f32 %v881_v19 }
 0x404   : > { %v884_v20 = vpop.xlane.xlu0 %883 }
 0x405   : > { %1580 = vrcp.f32 %v884_v20 }
 0x408   : > { %v887_v21 = vpop.xlane.xlu1 %886 }
 0x40a   : > { %v890_v22 = vpop.xlane.xlu0 %889 }
 0x40b   : > { %1582 = vrcp.f32 %v890_v22  ;;  %v1579_v23 = vpop.eup %1578 }
 0x40c   : > { %1584 = vrcp.f32 %v887_v21  ;;  %v907_v25 = vmul.f32 %v1579_v23, %v1563_v53 }
 0x40f   : > { %v1581_v24 = vpop.eup %1580 }
 0x410   : > { %v908_v26 = vmul.f32 %v1581_v24, %v1565_v58  ;;  %v893_v27 = vpop.xlane.xlu1 %892 }
 0x411   : > { %1586 = vrcp.f32 %v893_v27 }
 0x412   : > { %v896_v28 = vpop.xlane.xlu0 %895  ;;  %v914_v29 = vpack.c.bf16 %v908_v26, %v907_v25 }
 0x413   : > { %1588 = vrcp.f32 %v896_v28 }
 0x414   : > { %v1555_v30 = vpop.permute.xlu1 %1554  ;;  %1412 = vmatmul.mubr.msk.bf16.vlgmr.msra.gmra.mrb[20].mxu1 %vm824_vm2, %v914_v29 }
 0x415   : > { %v1583_v31 = vpop.eup %1582  ;;  %v1557_v32 = vunpack.i.h.bf16 %v1555_v30  ;;  %v1556_v33 = vunpack.i.l.bf16 %v1555_v30  ;;  %1423 = vmatprep.mubr.msk.bf16.mxu1 %vm1787_vm0, %v1786_v0 }
 0x416   : > { %v1550_v34 = vpop.permute.xlu0 %1549  ;;  %v1585_v35 = vpop.eup %1584  ;;  %v910_v39 = vmul.f32 %v1583_v31, %v1569_v6 }
 0x417   : > { %v634_v36 = vpack.c.bf16 %v1557_v32, %v1556_v33  ;;  %v1552_v37 = vunpack.i.h.bf16 %v1550_v34  ;;  %v1551_v38 = vunpack.i.l.bf16 %v1550_v34  ;;  %v909_v41 = vmul.f32 %v1585_v35, %v1567_v3 }
 0x419   : > { %v633_v40 = vpack.c.bf16 %v1552_v37, %v1551_v38  ;;  %1422 = vmatpush3.bf16.msra.mxu1 %v634_v36  ;;  %v915_v43 = vpack.c.bf16 %v910_v39, %v909_v41 }
 0x41b   : > { %v1587_v42 = vpop.eup %1586  ;;  %1416 = vmatpush3.bf16.msra.mxu0 %v633_v40 }
 0x41c   : > { %v911_v45 = vmul.f32 %v1587_v42, %v1571_v8 }
 0x41d   : > { %v1589_v44 = vpop.eup %1588 }
 0x41e   : > { %v912_v46 = vmul.f32 %v1589_v44, %v1573_v10  ;;  %1418 = vmatmul.mubr.msk.bf16.vlgmr.msra.gmra.mrb[12].mxu0 %vm824_vm2, %v915_v43 }
 0x420   : > { %v916_v47 = vpack.c.bf16 %v912_v46, %v911_v45 }
 0x422   : > { %1424 = vmatmul.mubr.msk.bf16.vlgmr.msra.gmra.mrb[24].mxu1 %vm824_vm2, %v916_v47 }
 0x48a   : > { %v954_v0 = vpop.f32.mrb[8].mxu0 }
 0x48b   : > { %v1407_v48 = vpop.f32.mrb[9].mxu0 }
 0x48c   : > { %v957_v49 = vpop.f32.mrb[10].mxu0 }
 0x48d   : > { %v1408_v50 = vpop.f32.mrb[11].mxu0 }
 0x4e7   : > { %v998_v51 = vpop.f32.mrb[20].mxu1 }
 0x4e8   : > { %1095 = vrot.lane.b32.xlu1 %v998_v51, %s1790_s12  ;;  %v1413_v52 = vpop.f32.mrb[21].mxu1 }
 0x4e9   : > { %v1001_v53 = vpop.f32.mrb[22].mxu1 }
 0x4ea   : > { %1097 = vrot.lane.b32.xlu0 %v1001_v53, %s1790_s12  ;;  %v1414_v54 = vpop.f32.mrb[23].mxu1 }
 0x4f1   : > { %v1042_v55 = vpop.f32.mrb[12].mxu0 }
 0x4f2   : > { %1103 = vrot.lane.b32.xlu1 %v1042_v55, %s1788_s10  ;;  %v1419_v56 = vpop.f32.mrb[13].mxu0 }
 0x4f3   : > { %v1045_v57 = vpop.f32.mrb[14].mxu0 }
 0x4f4   : > { %1105 = vrot.lane.b32.xlu0 %v1045_v57, %s1788_s10  ;;  %v1420_v58 = vpop.f32.mrb[15].mxu0  ;;  %s1710_s10 = scalar_lea.vmem %s1709_s15, 512 }
 0x4f5   : > { %v1086_v59 = vpop.f32.mrb[24].mxu1  ;;  %p1712_p1 = scmp.lt.s32.totalorder %s1710_s10, %s1704_s9 }
 0x4f6   : > { %v1425_v60 = vpop.f32.mrb[25].mxu1  ;;  %1111 = vrot.lane.b32.xlu1 %v1086_v59, %s1789_s14 }
 0x4f7   : > { %v1089_v61 = vpop.f32.mrb[26].mxu1  ;;  %p1713_p2 = por %p1712_p1, %p1711_p12 }
 0x4f8   : > { %v1426_v62 = vpop.f32.mrb[27].mxu1  ;;  %1113 = vrot.lane.b32.xlu0 %v1089_v61, %s1789_s14 }
 0x4f9   : > { %p1714_p4 = pnand %p1713_p2, %p1707_p7 }
 0x55a   : > { %v1096_v63 = vpop.permute.xlu1 %1095 }
 0x55b   : > { %v1117_v4 = vsel %vm635_vm1, %v954_v0, %v1096_v63 }
 0x55c   : > { %v1098_v1 = vpop.permute.xlu0 %1097 }
 0x55d   : > { %v1118_v7 = vsel %vm635_vm1, %v957_v49, %v1098_v1 }
 0x564   : > { %v1104_v2 = vpop.permute.xlu1 %1103 }
 0x565   : > { %v1120_v5 = vsel %vm1119_vm3, %v1117_v4, %v1104_v2 }
 0x566   : > { %v1106_v3 = vpop.permute.xlu0 %1105 }
 0x567   : > { %v1121_v9 = vsel %vm1119_vm3, %v1118_v7, %v1106_v3 }
 0x568   : > { %v1112_v6 = vpop.permute.xlu1 %1111 }
 0x569   : > { %v1123_v8 = vsel %vm1122_vm4, %v1120_v5, %v1112_v6 }
 0x56a   : > { %1125 = vst [vmem:[%s340_s16] sm:$0xff] %v1123_v8  ;;  %v1114_v10 = vpop.permute.xlu0 %1113 }
 0x56b   : > { %v1124_v11 = vsel %vm1122_vm4, %v1121_v9, %v1114_v10 }
 0x56c   : > { %1126 = vst [vmem:[%s340_s16 + $0x8] sm:$0xff] %v1124_v11 }
 0x56d   : > { %1717 = shalt.err (!%p1714_p4)
}
 0x56e   : > { %s1718_s14 = scalar_lea.hbm %s2186_s23, 256  ;;  %s1722_s21 = scalar_lea.hbm %s2237_s7, 512 }
 0x56f   : > { %p1719_p9 = scmp.ne.s32.totalorder %s2186_s23, %s1718_s14  ;;  %p1723_p8 = scmp.lt.u32.totalorder %s2186_s23, %s2237_s7 }
 0x570   : > { %p1724_p13 = scmp.lt.u32.totalorder %s1722_s21, %s1718_s14  ;;  %p1726_p10 = scmp.lt.u32.totalorder %s1718_s14, %s2186_s23 }
 0x571   : > { %p1720_p0 = pnand %p1719_p9, %p1988_p5 }
 0x572   : > { %p1725_p6 = por %p1724_p13, %p1723_p8 }
 0x573   : > { %p1721_p11 = pneg %p1720_p0 }
 0x574   : > { %p1727_p3 = por %p1726_p10, %p1725_p6 }
 0x576   : > { %p1728_p7 = pnand %p1727_p3, %p1721_p11 }
 0x578   : > { %1731 = shalt.err (!%p1728_p7)
}
 0x579   : > { %s1792_s8 = smov 128   ;;  %s1793_s30 = smov 8  }
 0x57a   : > { %1441 = dma.vmem_to_hbm [thread:$0]  (%p1988_p5), %s2180_s29, 256, %s2186_s23, %s1128_s28, %s1792_s8, %s1792_s8, %s1793_s30  }
 0x57b PF: > { %s2257_s9 = sld [smem:[#allocation15_spill]]  ;;  %s1156_s13 = sand.u32 1, %s1766_s24  }
 0x57c   : > { %p2259_p1 = scmp.ge.s32.totalorder %s1778_s27, 2  ;;  %s1157_s15 = scalar_lea.sflag [#allocation4], %s1156_s13 }
 0x581   : > { %p2258_p12 = scmp.ne.s32.totalorder %s2257_s9, 0 }
 0x583   : > { %p1458_p2 = pnand %p2259_p1, %p2258_p12 }
 0x585   : > { %1761 = dma.done.wait (!%p1458_p2), %s1157_s15, 256  }
 0x586   : > { %1763 = vsyncadd (!%p1458_p2), %s1157_s15, 4294967040  ;;  %p22_p4 = scmp.ge.s32.totalorder %s1974_s22, 4   ;;  %s2260_s24 = smov %s1770_s25 }
 0x587   : > { %s2261_s25 = smov %s1774_s26  ;;  %s2262_s26 = smov %s1984_s18 }
 0x588   : > { %s2263_s27 = smov %s1974_s22  ;;  %24 = sbr.rel (!%p22_p4) target bundleno = 7 (0x7), region = 105 }
 0x58f   :  { %1162 = vsyncpa [#allocation3], 1 }
 0x590   :  { %1164 = vsyncpa [#allocation3 + $0x1], 1 }
 0x591   :  { %1165 = vsyncpa [#allocation6], 1 }
 0x592   :  { %1166 = vsyncpa [#allocation9], 1 }
 0x593   :  { %1167 = vsyncpa [#allocation4], 1 }
 0x594   :  { %1169 = vsyncpa [#allocation4 + $0x1], 1 }

</bundles_post_ra>
